<compile_context>
chip_gen: v7x
topology: tpu7x:2x2x1
jax: 0.10.0
libtpu: 0.0.40
codegen_flags: <defaults>
</compile_context>

<pallas_src>
import functools

import jax
import jax.numpy as jnp
from jax.experimental import pallas as pl
from jax.experimental.pallas import tpu as pltpu

LANE = 128
SUBLANE = 16  # covers both f32 (8) and bf16 (16) sublane packing


def _round_up(x, m):
    return (x + m - 1) // m * m


# --------------------------------------------------------------------------
# Kernel
# --------------------------------------------------------------------------
def additive_attention_kernel(q_ref, k_ref, v_ref, wq_ref, wk_ref, wv_ref,
                              o_ref, qh_sc, m_sc, l_sc, acc_sc,
                              *, compute_dtype, k_real, approx_recip):
    Bt, Qt, Dq = q_ref.shape
    _, Kt, Dk = k_ref.shape
    H = wq_ref.shape[1]              # padded hidden size

    kv = pl.program_id(2)

    @pl.when(kv == 0)
    def _init():
        # Project queries once per (batch-block, Q-tile); keep resident in VMEM.
        q2 = q_ref[...].reshape(Bt * Qt, Dq)
        qh = jnp.dot(q2, wq_ref[...], preferred_element_type=jnp.float32)
        qh_sc[...] = qh.reshape(Bt, Qt, H).astype(compute_dtype)
        m_sc[...] = jnp.full(m_sc.shape, -jnp.inf, m_sc.dtype)
        l_sc[...] = jnp.zeros(l_sc.shape, l_sc.dtype)
        acc_sc[...] = jnp.zeros(acc_sc.shape, acc_sc.dtype)

    # ---- Project current key tile (MXU, f32 accumulation). ----
    k2 = k_ref[...].reshape(Bt * Kt, Dk)
    kh = jnp.dot(k2, wk_ref[...], preferred_element_type=jnp.float32)    # (Bt*Kt, H)
    kh = kh.astype(compute_dtype).reshape(Bt, 1, Kt, H)
    kh_row = jnp.swapaxes(kh, 2, 3)                                      # (Bt, 1, H, Kt)

    # qh as per-(b,q) H-columns: (Bt, Qt, H, 1) -> H on sublanes.
    qh_col = jnp.swapaxes(qh_sc[...].reshape(Bt, Qt, 1, H), 2, 3)        # (Bt, Qt, H, 1)

    # ---- Additive features: H on sublanes, keys on the 128-lane axis. ----
    feat = jnp.tanh(qh_col + kh_row)                                     # (Bt, Qt, H, Kt)

    # ---- wv-weighted contraction over H: sublane reduce, f32 accumulation. ----
    wv_col = wv_ref[...].astype(compute_dtype)                           # (H, 1)
    scores = jnp.sum((feat * wv_col[None, None, :, :]).astype(jnp.float32),
                     axis=2)                                             # (Bt, Qt, Kt)

    # ---- Mask padded key lanes (NOT neutral: tanh(qh + 0) * wv != 0). ----
    if k_real is not None:
        key_idx = kv * Kt + jax.lax.broadcasted_iota(jnp.int32, scores.shape, 2)
        scores = jnp.where(key_idx < k_real, scores, -jnp.inf)

    # ---- Online softmax update over the key axis. ----
    m_prev = m_sc[...]
    m_new = jnp.maximum(m_prev, jnp.max(scores, axis=-1, keepdims=True))
    alpha = jnp.exp(m_prev - m_new)
    p = jnp.exp(scores - m_new)                                          # (Bt, Qt, Kt)
    l_sc[...] = alpha * l_sc[...] + jnp.sum(p, axis=-1, keepdims=True)
    acc_sc[...] = alpha * acc_sc[...] + jnp.einsum(
        'bqk,bkd->bqd', p.astype(v_ref.dtype), v_ref[...],
        preferred_element_type=jnp.float32)                              # (Bt, Qt, Dv)
    m_sc[...] = m_new

    @pl.when(kv == pl.num_programs(2) - 1)
    def _finalize():
        if approx_recip:
            inv_l = pl.reciprocal(l_sc[...], approx=True)
            o_ref[...] = (acc_sc[...] * inv_l).astype(o_ref.dtype)
        else:
            o_ref[...] = (acc_sc[...] / l_sc[...]).astype(o_ref.dtype)


# --------------------------------------------------------------------------
# Generation-aware planning
# --------------------------------------------------------------------------
def _tpu_generation():
    try:
        kind = jax.devices()[0].device_kind.lower()
    except Exception:
        return "other"
    if "v7" in kind:
        return "v7x"
    if "v6" in kind:
        return "v6e"
    if "v5e" in kind or "v5 lite" in kind or "v5lite" in kind:
        return "v5e"
    return "other"


def _gen_config(gen):
    # bf16 tanh/add slab only where VPU/EUP are bf16-capable (v6e/v7x);
    # f32 elsewhere (v5e has no bf16 VPU/EUP -> casting only adds work).
    if gen == "v7x":    # 2 TensorCores, 64 MiB VMEM per core
        return dict(compute_dtype=jnp.bfloat16, max_kt=256,
                    vmem_budget=24 << 20, vmem_limit=40 << 20, min_parallel=2)
    if gen == "v6e":    # 128 MiB VMEM, bf16 VPU/EUP
        return dict(compute_dtype=jnp.bfloat16, max_kt=512,
                    vmem_budget=56 << 20, vmem_limit=96 << 20, min_parallel=1)
    if gen == "v5e":    # 128 MiB VMEM, default scoped limit only 16 MiB
        return dict(compute_dtype=jnp.float32, max_kt=512,
                    vmem_budget=48 << 20, vmem_limit=80 << 20, min_parallel=1)
    return dict(compute_dtype=jnp.float32, max_kt=256,
                vmem_budget=24 << 20, vmem_limit=48 << 20, min_parallel=1)


def _vmem_bytes_estimate(bt, Qt, Kt, Dq_p, Dk_p, Dv_p, H_p, csize):
    """Honest peak estimate: pre/feat/prod are separate VMEM temporaries (the
    compiler does not fuse the whole chain), plus f32 scores/p, 2x-buffered
    input/output blocks, weights and scratch."""
    slab = 3 * bt * Qt * H_p * Kt * csize            # pre, feat, prod
    scores = 2 * bt * Qt * Kt * 4                    # scores, p (f32)
    blocks = 2 * 4 * bt * (Qt * Dq_p + Kt * Dk_p + Kt * Dv_p + Qt * Dv_p)
    weights = 2 * 4 * (Dq_p * H_p + Dk_p * H_p + H_p * LANE)
    scratch = bt * Qt * (LANE * csize + 2 * LANE * 4 + Dv_p * 4)
    return slab + scores + blocks + weights + scratch


def _pick_block_b(B, Qt, Kt, Dq_p, Dk_p, Dv_p, H_p, csize, budget, max_bt):
    best = 1
    for bt in range(1, min(B, max_bt) + 1):
        if B % bt:
            continue
        if _vmem_bytes_estimate(bt, Qt, Kt, Dq_p, Dk_p, Dv_p, H_p, csize) <= budget:
            best = bt
    return best


# --------------------------------------------------------------------------
# Wrapper
# --------------------------------------------------------------------------
def additive_attention(queries, keys, values, wq_t, wk_t, wv_row, *,
                       compute_dtype=None, block_b=None):
    """queries (B,Q,Dq), keys (B,K,Dk), values (B,K,Dv);
       wq_t (Dq,H) = W_q.weight.T, wk_t (Dk,H) = W_k.weight.T,
       wv_row (1,H) = w_v.weight.  Returns (B,Q,Dv)."""
    B, Q, Dq = queries.shape
    _, K, Dk = keys.shape
    _, _, Dv = values.shape
    H = wq_t.shape[1]

    gen = _tpu_generation()
    cfg = _gen_config(gen)
    if compute_dtype is None:
        compute_dtype = cfg["compute_dtype"]
    csize = jnp.dtype(compute_dtype).itemsize

    # Lane padding of MXU contraction dims / value lanes is zero-neutral;
    # H is only padded to a sublane multiple (it lives on sublanes now).
    Dq_p, Dk_p, Dv_p = (_round_up(d, LANE) for d in (Dq, Dk, Dv))
    H_p = _round_up(H, SUBLANE)

    # Tile sizes: keys on the lane axis in multiples of 128, queries in
    # multiples of 8 (capped at 128).
    Kt = min(_round_up(K, LANE), cfg["max_kt"])
    K_pad = _round_up(K, Kt)
    Qt = min(_round_up(Q, 8), 128)
    Q_pad = _round_up(Q, Qt)
    n_q_tiles = Q_pad // Qt

    max_bt = B
    if (cfg["min_parallel"] > 1 and n_q_tiles < cfg["min_parallel"]
            and B >= cfg["min_parallel"]):
        # Keep >= 2 parallel grid steps so both v7x TensorCores get work.
        max_bt = max(1, B // cfg["min_parallel"])
    if block_b is None:
        block_b = _pick_block_b(B, Qt, Kt, Dq_p, Dk_p, Dv_p, H_p, csize,
                                cfg["vmem_budget"], max_bt)
    assert B % block_b == 0, "block_b must divide B"

    # Zero-pad.  Feature-dim padding is neutral; padded keys are masked to
    # -inf inside the kernel; padded query rows are sliced off below.
    q_p = jnp.pad(queries, ((0, 0), (0, Q_pad - Q), (0, Dq_p - Dq)))
    k_p = jnp.pad(keys, ((0, 0), (0, K_pad - K), (0, Dk_p - Dk)))
    v_p = jnp.pad(values, ((0, 0), (0, K_pad - K), (0, Dv_p - Dv)))
    wq_p = jnp.pad(wq_t, ((0, Dq_p - Dq), (0, H_p - H)))
    wk_p = jnp.pad(wk_t, ((0, Dk_p - Dk), (0, H_p - H)))
    wv_p = jnp.pad(jnp.reshape(wv_row, (H, 1)), ((0, H_p - H), (0, 0)))

    grid = (B // block_b, n_q_tiles, K_pad // Kt)

    cost = pl.CostEstimate(
        flops=int(2 * B * Q_pad * Dq_p * H_p
                  + 2 * B * K_pad * Dk_p * H_p * n_q_tiles
                  + 4 * B * Q_pad * K_pad * H_p
                  + 2 * B * Q_pad * K_pad * Dv_p
                  + 10 * B * Q_pad * K_pad),
        transcendentals=int(B * Q_pad * K_pad * H_p + B * Q_pad * K_pad),
        bytes_accessed=int(4 * (q_p.size + (k_p.size + v_p.size) * n_q_tiles
                                + B * Q_pad * Dv_p
                                + wq_p.size + wk_p.size + wv_p.size)),
    )

    kernel = functools.partial(
        additive_attention_kernel,
        compute_dtype=compute_dtype,
        k_real=K if K_pad != K else None,
        approx_recip=(jnp.dtype(compute_dtype) == jnp.dtype(jnp.bfloat16)),
    )

    out_p = pl.pallas_call(
        kernel,
        out_shape=jax.ShapeDtypeStruct((B, Q_pad, Dv_p), queries.dtype),
        grid_spec=pltpu.PrefetchScalarGridSpec(
            num_scalar_prefetch=0,
            grid=grid,
            in_specs=[
                pl.BlockSpec((block_b, Qt, Dq_p), lambda b, qi, kv: (b, qi, 0)),
                pl.BlockSpec((block_b, Kt, Dk_p), lambda b, qi, kv: (b, kv, 0)),
                pl.BlockSpec((block_b, Kt, Dv_p), lambda b, qi, kv: (b, kv, 0)),
                pl.BlockSpec((Dq_p, H_p), lambda b, qi, kv: (0, 0)),
                pl.BlockSpec((Dk_p, H_p), lambda b, qi, kv: (0, 0)),
                pl.BlockSpec((H_p, 1), lambda b, qi, kv: (0, 0)),
            ],
            out_specs=pl.BlockSpec((block_b, Qt, Dv_p),
                                   lambda b, qi, kv: (b, qi, 0)),
            scratch_shapes=[
                pltpu.VMEM((block_b, Qt, H_p), compute_dtype),   # qh (resident)
                pltpu.VMEM((block_b, Qt, 1), jnp.float32),       # m (running max)
                pltpu.VMEM((block_b, Qt, 1), jnp.float32),       # l (running denom)
                pltpu.VMEM((block_b, Qt, Dv_p), jnp.float32),    # acc
            ],
        ),
        compiler_params=pltpu.CompilerParams(
            dimension_semantics=("parallel", "parallel", "arbitrary"),
            vmem_limit_bytes=cfg["vmem_limit"]),
        cost_estimate=cost,
    )(q_p, k_p, v_p, wq_p, wk_p, wv_p)

    return out_p[:, :Q, :Dv]


# --------------------------------------------------------------------------
# Pure-JAX reference
# --------------------------------------------------------------------------
def reference(queries, keys, values, wq_t, wk_t, wv_row):
    qh = queries @ wq_t                                       # (B,Q,H)
    kh = keys @ wk_t                                          # (B,K,H)
    feat = jnp.tanh(qh[:, :, None, :] + kh[:, None, :, :])    # (B,Q,K,H)
    scores = jnp.einsum('bqkh,h->bqk', feat, jnp.reshape(wv_row, (-1,)))
    attn = jax.nn.softmax(scores, axis=-1)
    return jnp.einsum('bqk,bkd->bqd', attn, values)


if __name__ == "__main__":
    # Small shapes consistent with the module's forward.
    B, Q, K = 2, 8, 8
    query_size, key_size, num_hiddens, value_dim = 20, 16, 32, 24

    rng = jax.random.PRNGKey(0)
    k1, k2, k3, k4, k5, k6 = jax.random.split(rng, 6)

    queries = jax.random.normal(k1, (B, Q, query_size), dtype=jnp.float32)
    keys = jax.random.normal(k2, (B, K, key_size), dtype=jnp.float32)
    values = jax.random.normal(k3, (B, K, value_dim), dtype=jnp.float32)

    # Deterministic parameter init (nn.Linear weights, stored pre-transposed).
    wq_t = 0.1 * jax.random.normal(k4, (query_size, num_hiddens), dtype=jnp.float32)
    wk_t = 0.1 * jax.random.normal(k5, (key_size, num_hiddens), dtype=jnp.float32)
    wv_row = 0.1 * jax.random.normal(k6, (1, num_hiddens), dtype=jnp.float32)

    ref = reference(queries, keys, values, wq_t, wk_t, wv_row)

    # 1) f32 compute path: tight check against the f32 reference.
    out_f32 = additive_attention(queries, keys, values, wq_t, wk_t, wv_row,
                                 compute_dtype=jnp.float32)
    out_f32 = jax.block_until_ready(out_f32)
    assert out_f32.shape == (B, Q, value_dim)
    assert jnp.allclose(out_f32, ref, atol=1e-5, rtol=1e-5), "f32 mismatch vs reference"

    # 2) generation-default path (bf16 tanh/add slab on v6e/v7x, f32 elsewhere).
    out_auto = additive_attention(queries, keys, values, wq_t, wk_t, wv_row)
    out_auto = jax.block_until_ready(out_auto)
    auto_dtype = _gen_config(_tpu_generation())["compute_dtype"]
    tol = 1e-5 if jnp.dtype(auto_dtype) == jnp.dtype(jnp.float32) else 5e-2
    assert out_auto.shape == (B, Q, value_dim)
    assert jnp.allclose(out_auto, ref, atol=tol, rtol=tol), "auto-path mismatch vs reference"

    print("KERNEL_OK")
</pallas_src>

<mosaic_0001>
module attributes {stable_mosaic.version = 11 : i64} {
  func.func @additive_attention_kernel(%arg0: i32, %arg1: i32, %arg2: i32, %arg3: memref<2x8x128xf32, #tpu.memory_space<vmem>>, %arg4: memref<2x128x128xf32, #tpu.memory_space<vmem>>, %arg5: memref<2x128x128xf32, #tpu.memory_space<vmem>>, %arg6: memref<128x32xf32, #tpu.memory_space<vmem>>, %arg7: memref<128x32xf32, #tpu.memory_space<vmem>>, %arg8: memref<32x1xf32, #tpu.memory_space<vmem>>, %arg9: memref<2x8x128xf32, #tpu.memory_space<vmem>>, %arg10: memref<2x8x32xf32, #tpu.memory_space<vmem>>, %arg11: memref<2x8x1xf32, #tpu.memory_space<vmem>>, %arg12: memref<2x8x1xf32, #tpu.memory_space<vmem>>, %arg13: memref<2x8x128xf32, #tpu.memory_space<vmem>>) attributes {dimension_semantics = [#tpu.dimension_semantics<parallel>, #tpu.dimension_semantics<parallel>, #tpu.dimension_semantics<arbitrary>], iteration_bounds = array<i64: 1, 1, 1>, scalar_prefetch = 0 : i64, scratch_operands = 4 : i64, tpu.core_type = #tpu.core_type<tc>, window_params = [{transform_indices = @transform_0, window_bounds = array<i64: 2, 8, 128>}, {transform_indices = @transform_1, window_bounds = array<i64: 2, 128, 128>}, {transform_indices = @transform_2, window_bounds = array<i64: 2, 128, 128>}, {pipeline_mode = #tpu.pipeline_mode<synchronous>, transform_indices = @transform_3, window_bounds = array<i64: 128, 32>}, {pipeline_mode = #tpu.pipeline_mode<synchronous>, transform_indices = @transform_4, window_bounds = array<i64: 128, 32>}, {pipeline_mode = #tpu.pipeline_mode<synchronous>, transform_indices = @transform_5, window_bounds = array<i64: 32, 1>}, {transform_indices = @transform_6, window_bounds = array<i64: 2, 8, 128>}]} {
    %c0_i32 = arith.constant 0 : i32
    %0 = arith.cmpi eq, %arg2, %c0_i32 : i32
    %1 = arith.extui %0 : i1 to i32
    %c0_i32_0 = arith.constant 0 : i32
    %2 = arith.cmpi ne, %1, %c0_i32_0 : i32
    scf.if %2 {
      %c0_38 = arith.constant 0 : index
      %c0_39 = arith.constant 0 : index
      %c0_40 = arith.constant 0 : index
      %55 = vector.load %arg3[%c0_38, %c0_39, %c0_40] : memref<2x8x128xf32, #tpu.memory_space<vmem>>, vector<2x8x128xf32>
      %56 = vector.shape_cast %55 : vector<2x8x128xf32> to vector<16x128xf32>
      %c0_41 = arith.constant 0 : index
      %c0_42 = arith.constant 0 : index
      %57 = vector.load %arg6[%c0_41, %c0_42] : memref<128x32xf32, #tpu.memory_space<vmem>>, vector<128x32xf32>
      %cst_43 = arith.constant dense<0.000000e+00> : vector<16x32xf32>
      %58 = tpu.matmul %56, %57, %cst_43 {dimension_numbers = #tpu.dot_dimension_numbers<[1], [0], [0], [1], [0, 0, 1, 1], [], []>} : vector<16x128xf32>, vector<128x32xf32>, vector<16x32xf32> -> vector<16x32xf32>
      %59 = vector.shape_cast %58 : vector<16x32xf32> to vector<2x8x32xf32>
      %c0_44 = arith.constant 0 : index
      %c0_45 = arith.constant 0 : index
      %c0_46 = arith.constant 0 : index
      %60 = vector.load %arg10[%c0_44, %c0_45, %c0_46] : memref<2x8x32xf32, #tpu.memory_space<vmem>>, vector<2x8x32xf32>
      tpu.vector_store %arg10[%c0_44, %c0_45, %c0_46], %59 {strides = array<i32>} : memref<2x8x32xf32, #tpu.memory_space<vmem>>, vector<2x8x32xf32>,
      %cst_47 = arith.constant 0xFF800000 : f32
      %61 = vector.broadcast %cst_47 : f32 to vector<2x8x1xf32>
      %c0_48 = arith.constant 0 : index
      %c0_49 = arith.constant 0 : index
      %c0_50 = arith.constant 0 : index
      %62 = vector.load %arg11[%c0_48, %c0_49, %c0_50] : memref<2x8x1xf32, #tpu.memory_space<vmem>>, vector<2x8x1xf32>
      tpu.vector_store %arg11[%c0_48, %c0_49, %c0_50], %61 {strides = array<i32>} : memref<2x8x1xf32, #tpu.memory_space<vmem>>, vector<2x8x1xf32>,
      %cst_51 = arith.constant 0.000000e+00 : f32
      %63 = vector.broadcast %cst_51 : f32 to vector<2x8x1xf32>
      %c0_52 = arith.constant 0 : index
      %c0_53 = arith.constant 0 : index
      %c0_54 = arith.constant 0 : index
      %64 = vector.load %arg12[%c0_52, %c0_53, %c0_54] : memref<2x8x1xf32, #tpu.memory_space<vmem>>, vector<2x8x1xf32>
      tpu.vector_store %arg12[%c0_52, %c0_53, %c0_54], %63 {strides = array<i32>} : memref<2x8x1xf32, #tpu.memory_space<vmem>>, vector<2x8x1xf32>,
      %cst_55 = arith.constant 0.000000e+00 : f32
      %65 = vector.broadcast %cst_55 : f32 to vector<2x8x128xf32>
      %c0_56 = arith.constant 0 : index
      %c0_57 = arith.constant 0 : index
      %c0_58 = arith.constant 0 : index
      %66 = vector.load %arg13[%c0_56, %c0_57, %c0_58] : memref<2x8x128xf32, #tpu.memory_space<vmem>>, vector<2x8x128xf32>
      tpu.vector_store %arg13[%c0_56, %c0_57, %c0_58], %65 {strides = array<i32>} : memref<2x8x128xf32, #tpu.memory_space<vmem>>, vector<2x8x128xf32>,
    } else {
    }
    %c0 = arith.constant 0 : index
    %c0_1 = arith.constant 0 : index
    %c0_2 = arith.constant 0 : index
    %3 = vector.load %arg4[%c0, %c0_1, %c0_2] : memref<2x128x128xf32, #tpu.memory_space<vmem>>, vector<2x128x128xf32>
    %4 = vector.shape_cast %3 : vector<2x128x128xf32> to vector<256x128xf32>
    %c0_3 = arith.constant 0 : index
    %c0_4 = arith.constant 0 : index
    %5 = vector.load %arg7[%c0_3, %c0_4] : memref<128x32xf32, #tpu.memory_space<vmem>>, vector<128x32xf32>
    %cst = arith.constant dense<0.000000e+00> : vector<256x32xf32>
    %6 = tpu.matmul %4, %5, %cst {dimension_numbers = #tpu.dot_dimension_numbers<[1], [0], [0], [1], [0, 0, 1, 1], [], []>} : vector<256x128xf32>, vector<128x32xf32>, vector<256x32xf32> -> vector<256x32xf32>
    %7 = vector.shape_cast %6 : vector<256x32xf32> to vector<2x1x128x32xf32>
    %8 = tpu.transpose %7, [0, 1, 3, 2] : vector<2x1x128x32xf32> -> vector<2x1x32x128xf32>
    %c0_5 = arith.constant 0 : index
    %c0_6 = arith.constant 0 : index
    %c0_7 = arith.constant 0 : index
    %9 = vector.load %arg10[%c0_5, %c0_6, %c0_7] : memref<2x8x32xf32, #tpu.memory_space<vmem>>, vector<2x8x32xf32>
    %10 = vector.shape_cast %9 : vector<2x8x32xf32> to vector<2x8x1x32xf32>
    %11 = tpu.transpose %10, [0, 1, 3, 2] : vector<2x8x1x32xf32> -> vector<2x8x32x1xf32>
    %12 = vector.broadcast %11 : vector<2x8x32x1xf32> to vector<2x8x32x128xf32>
    %13 = vector.broadcast %8 : vector<2x1x32x128xf32> to vector<2x8x32x128xf32>
    %14 = arith.addf %12, %13 : vector<2x8x32x128xf32>
    %15 = math.tanh %14 : vector<2x8x32x128xf32>
    %c0_8 = arith.constant 0 : index
    %c0_9 = arith.constant 0 : index
    %16 = vector.load %arg8[%c0_8, %c0_9] : memref<32x1xf32, #tpu.memory_space<vmem>>, vector<32x1xf32>
    %17 = vector.shape_cast %16 : vector<32x1xf32> to vector<1x1x32x1xf32>
    %18 = vector.broadcast %17 : vector<1x1x32x1xf32> to vector<2x8x32x128xf32>
    %19 = arith.mulf %15, %18 : vector<2x8x32x128xf32>
    %cst_10 = arith.constant dense<0.000000e+00> : vector<2x8x128xf32>
    %20 = vector.multi_reduction <add>, %19, %cst_10 [2] : vector<2x8x32x128xf32> to vector<2x8x128xf32>
    %c128_i32 = arith.constant 128 : i32
    %21 = arith.muli %arg2, %c128_i32 : i32
    %22 = tpu.iota {dimensions = array<i32: 2>} : vector<2x8x128xi32>
    %23 = vector.broadcast %21 : i32 to vector<2x8x128xi32>
    %24 = arith.addi %23, %22 : vector<2x8x128xi32>
    %c8_i32 = arith.constant 8 : i32
    %25 = vector.broadcast %c8_i32 : i32 to vector<2x8x128xi32>
    %26 = arith.cmpi slt, %24, %25 : vector<2x8x128xi32>
    %cst_11 = arith.constant 0xFF800000 : f32
    %27 = vector.broadcast %cst_11 : f32 to vector<2x8x128xf32>
    %28 = arith.select %26, %20, %27 : vector<2x8x128xi1>, vector<2x8x128xf32>
    %c0_12 = arith.constant 0 : index
    %c0_13 = arith.constant 0 : index
    %c0_14 = arith.constant 0 : index
    %29 = vector.load %arg11[%c0_12, %c0_13, %c0_14] : memref<2x8x1xf32, #tpu.memory_space<vmem>>, vector<2x8x1xf32>
    %cst_15 = arith.constant dense<0xFF800000> : vector<2x8xf32>
    %30 = vector.multi_reduction <maximumf>, %28, %cst_15 [2] : vector<2x8x128xf32> to vector<2x8xf32>
    %31 = vector.shape_cast %30 : vector<2x8xf32> to vector<2x8x1xf32>
    %32 = arith.maximumf %29, %31 : vector<2x8x1xf32>
    %33 = arith.subf %29, %32 : vector<2x8x1xf32>
    %34 = math.exp %33 : vector<2x8x1xf32>
    %35 = vector.broadcast %32 : vector<2x8x1xf32> to vector<2x8x128xf32>
    %36 = arith.subf %28, %35 : vector<2x8x128xf32>
    %37 = math.exp %36 : vector<2x8x128xf32>
    %c0_16 = arith.constant 0 : index
    %c0_17 = arith.constant 0 : index
    %c0_18 = arith.constant 0 : index
    %38 = vector.load %arg12[%c0_16, %c0_17, %c0_18] : memref<2x8x1xf32, #tpu.memory_space<vmem>>, vector<2x8x1xf32>
    %39 = arith.mulf %34, %38 : vector<2x8x1xf32>
    %cst_19 = arith.constant dense<0.000000e+00> : vector<2x8xf32>
    %40 = vector.multi_reduction <add>, %37, %cst_19 [2] : vector<2x8x128xf32> to vector<2x8xf32>
    %41 = vector.shape_cast %40 : vector<2x8xf32> to vector<2x8x1xf32>
    %42 = arith.addf %39, %41 : vector<2x8x1xf32>
    %c0_20 = arith.constant 0 : index
    %c0_21 = arith.constant 0 : index
    %c0_22 = arith.constant 0 : index
    %43 = vector.load %arg12[%c0_20, %c0_21, %c0_22] : memref<2x8x1xf32, #tpu.memory_space<vmem>>, vector<2x8x1xf32>
    tpu.vector_store %arg12[%c0_20, %c0_21, %c0_22], %42 {strides = array<i32>} : memref<2x8x1xf32, #tpu.memory_space<vmem>>, vector<2x8x1xf32>,
    %c0_23 = arith.constant 0 : index
    %c0_24 = arith.constant 0 : index
    %c0_25 = arith.constant 0 : index
    %44 = vector.load %arg13[%c0_23, %c0_24, %c0_25] : memref<2x8x128xf32, #tpu.memory_space<vmem>>, vector<2x8x128xf32>
    %45 = vector.broadcast %34 : vector<2x8x1xf32> to vector<2x8x128xf32>
    %46 = arith.mulf %45, %44 : vector<2x8x128xf32>
    %c0_26 = arith.constant 0 : index
    %c0_27 = arith.constant 0 : index
    %c0_28 = arith.constant 0 : index
    %47 = vector.load %arg5[%c0_26, %c0_27, %c0_28] : memref<2x128x128xf32, #tpu.memory_space<vmem>>, vector<2x128x128xf32>
    "tpu.trace_start"() <{level = 10 : i32, message = "bqk,bkd->bqd"}> : () -> ()
    %cst_29 = arith.constant dense<0.000000e+00> : vector<2x8x128xf32>
    %48 = tpu.matmul %37, %47, %cst_29 {dimension_numbers = #tpu.dot_dimension_numbers<[2], [1], [1], [2], [0, 0, 0, 1, 1, 2], [0], [0]>} : vector<2x8x128xf32>, vector<2x128x128xf32>, vector<2x8x128xf32> -> vector<2x8x128xf32>
    "tpu.trace_stop"() : () -> ()
    %49 = arith.addf %46, %48 : vector<2x8x128xf32>
    %c0_30 = arith.constant 0 : index
    %c0_31 = arith.constant 0 : index
    %c0_32 = arith.constant 0 : index
    %50 = vector.load %arg13[%c0_30, %c0_31, %c0_32] : memref<2x8x128xf32, #tpu.memory_space<vmem>>, vector<2x8x128xf32>
    tpu.vector_store %arg13[%c0_30, %c0_31, %c0_32], %49 {strides = array<i32>} : memref<2x8x128xf32, #tpu.memory_space<vmem>>, vector<2x8x128xf32>,
    %c0_33 = arith.constant 0 : index
    %c0_34 = arith.constant 0 : index
    %c0_35 = arith.constant 0 : index
    %51 = vector.load %arg11[%c0_33, %c0_34, %c0_35] : memref<2x8x1xf32, #tpu.memory_space<vmem>>, vector<2x8x1xf32>
    tpu.vector_store %arg11[%c0_33, %c0_34, %c0_35], %32 {strides = array<i32>} : memref<2x8x1xf32, #tpu.memory_space<vmem>>, vector<2x8x1xf32>,
    %c0_i32_36 = arith.constant 0 : i32
    %52 = arith.cmpi eq, %arg2, %c0_i32_36 : i32
    %53 = arith.extui %52 : i1 to i32
    %c0_i32_37 = arith.constant 0 : i32
    %54 = arith.cmpi ne, %53, %c0_i32_37 : i32
    scf.if %54 {
      %c0_38 = arith.constant 0 : index
      %c0_39 = arith.constant 0 : index
      %c0_40 = arith.constant 0 : index
      %55 = vector.load %arg13[%c0_38, %c0_39, %c0_40] : memref<2x8x128xf32, #tpu.memory_space<vmem>>, vector<2x8x128xf32>
      %c0_41 = arith.constant 0 : index
      %c0_42 = arith.constant 0 : index
      %c0_43 = arith.constant 0 : index
      %56 = vector.load %arg12[%c0_41, %c0_42, %c0_43] : memref<2x8x1xf32, #tpu.memory_space<vmem>>, vector<2x8x1xf32>
      %57 = vector.broadcast %56 : vector<2x8x1xf32> to vector<2x8x128xf32>
      %58 = arith.divf %55, %57 : vector<2x8x128xf32>
      %c0_44 = arith.constant 0 : index
      %c0_45 = arith.constant 0 : index
      %c0_46 = arith.constant 0 : index
      %59 = vector.load %arg9[%c0_44, %c0_45, %c0_46] : memref<2x8x128xf32, #tpu.memory_space<vmem>>, vector<2x8x128xf32>
      tpu.vector_store %arg9[%c0_44, %c0_45, %c0_46], %58 {strides = array<i32>} : memref<2x8x128xf32, #tpu.memory_space<vmem>>, vector<2x8x128xf32>,
    } else {
    }
    return
  }
  func.func @transform_0(%arg0: i32, %arg1: i32, %arg2: i32) -> (i32, i32, i32) {
    %c0_i32 = arith.constant 0 : i32
    %c0_i32_0 = arith.constant 0 : i32
    return %arg0, %arg1, %c0_i32 : i32, i32, i32
  }
  func.func @transform_1(%arg0: i32, %arg1: i32, %arg2: i32) -> (i32, i32, i32) {
    %c0_i32 = arith.constant 0 : i32
    %c0_i32_0 = arith.constant 0 : i32
    return %arg0, %arg2, %c0_i32 : i32, i32, i32
  }
  func.func @transform_2(%arg0: i32, %arg1: i32, %arg2: i32) -> (i32, i32, i32) {
    %c0_i32 = arith.constant 0 : i32
    %c0_i32_0 = arith.constant 0 : i32
    return %arg0, %arg2, %c0_i32 : i32, i32, i32
  }
  func.func @transform_3(%arg0: i32, %arg1: i32, %arg2: i32) -> (i32, i32) {
    %c0_i32 = arith.constant 0 : i32
    %c0_i32_0 = arith.constant 0 : i32
    %c0_i32_1 = arith.constant 0 : i32
    return %c0_i32, %c0_i32_0 : i32, i32
  }
  func.func @transform_4(%arg0: i32, %arg1: i32, %arg2: i32) -> (i32, i32) {
    %c0_i32 = arith.constant 0 : i32
    %c0_i32_0 = arith.constant 0 : i32
    %c0_i32_1 = arith.constant 0 : i32
    return %c0_i32, %c0_i32_0 : i32, i32
  }
  func.func @transform_5(%arg0: i32, %arg1: i32, %arg2: i32) -> (i32, i32) {
    %c0_i32 = arith.constant 0 : i32
    %c0_i32_0 = arith.constant 0 : i32
    %c0_i32_1 = arith.constant 0 : i32
    return %c0_i32, %c0_i32_0 : i32, i32
  }
  func.func @transform_6(%arg0: i32, %arg1: i32, %arg2: i32) -> (i32, i32, i32) {
    %c0_i32 = arith.constant 0 : i32
    %c0_i32_0 = arith.constant 0 : i32
    return %arg0, %arg1, %c0_i32 : i32, i32, i32
  }
}

</mosaic_0001>

<bundles_post_ra>
// kernel: tpu_custom_call.1
= control target key start
LH: loop header
LB: loop body
LE: loop exit
PB: predicated region body
PF: predicated region fallthrough
CT: control target
= control target key end

     0   :  { %11 = vsyncpa [#allocation7], 0  ;;  %s3456_s0 = inlined_call_operand.vmem [shape: f32[2,8,128], index: 0, kind: input, shape index: {}]   ;;  %s3457_s1 = inlined_call_operand.vmem [shape: f32[2,128,128], index: 1, kind: input, shape index: {}]   ;;  %s3458_s2 = inlined_call_operand.hbm [shape: f32[2,128,128], index: 2, kind: input, shape index: {}]   ;;  %s3459_s3 = inlined_call_operand.vmem [shape: f32[128,32], index: 3, kind: input, shape index: {}]   ;;  %s3460_s4 = inlined_call_operand.vmem [shape: f32[128,32], index: 4, kind: input, shape index: {}]   ;;  %s3461_s5 = inlined_call_operand.vmem [shape: f32[32,1], index: 5, kind: input, shape index: {}]   ;;  %s3462_s6 = inlined_call_operand.hbm [shape: f32[2,8,128], index: 6, kind: output, shape index: {}]  }
   0x1   :  { %12 = vsyncpa [#allocation8], 0  ;;  %s2713_s21 = smov [#allocation6]   ;;  %s2665_s25 = scalar_lea.hbm %s3458_s2, 4096 }
   0x2   :  { %s22_s22 = sshll.u32 %s2713_s21, 4  ;;  %p2666_p0 = scmp.ne.s32.totalorder %s3458_s2, %s2665_s25  ;;  %s23_s22 = int_to_ptr.vmem [resolvable:$true] %s22_s22 }
   0x3   :  { %p2669_p1 = scmp.lt.u32.totalorder %s2665_s25, %s3458_s2 }
   0x5   :  { %p2671_p2 = pnand %p2669_p1, %p2666_p0 }
   0x7   :  { %2674 = shalt.err (!%p2671_p2)
}
   0x8   :  { %s2675_s30 = scalar_lea.vmem %s23_s22, 4096  ;;  %p2680_p4 = scmp.lt.s32.totalorder %s23_s22, %s23_s22 }
   0x9   :  { %p2676_p3 = scmp.ne.s32.totalorder %s23_s22, %s2675_s30  ;;  %p2681_p5 = scmp.lt.s32.totalorder %s2675_s30, %s2675_s30 }
   0xb   :  { %p2682_p6 = por %p2681_p5, %p2680_p4 }
   0xd   :  { %p2683_p7 = pnand %p2682_p6, %p2676_p3 }
   0xf   :  { %2686 = shalt.err (!%p2683_p7)
}
  0x10   :  { %s2714_s7 = smov 128   ;;  %s2715_s8 = smov 8  }
  0x11   :  { %28 = dma.hbm_to_vmem [thread:$0]  %s3458_s2, 4096, %s23_s22, [#allocation7], %s2714_s7, %s2714_s7, %s2715_s8  }
  0x12   :  { %2709 = dma.done.wait [#allocation7], 4096  }
  0x13   :  { %2710 = vsyncadd [#allocation7], 4294963200  ;;  %v2716_v0 = vmov 0   ;;  %v44_v1 = vld [vmem:[%s3459_s3] sm:$0xff]  ;;  %v45_v2 = vld [vmem:[%s3459_s3 + $0x8] sm:$0xff]  ;;  %vm135_vm0 = vcmask 261120  }
  0x14   :  { %2522 = vset.pattern.permute.xlu1 %v2716_v0  ;;  %2521 = vset.pattern.permute.xlu0 %v2716_v0  ;;  %v46_v3 = vld [vmem:[%s3459_s3 + $0x10] sm:$0xff]  ;;  %v2399_v4 = vpack.c.bf16 %v45_v2, %v44_v1  ;;  %v47_v5 = vld [vmem:[%s3459_s3 + $0x18] sm:$0xff]  ;;  %v48_v7 = vld [vmem:[%s3459_s3 + $0x20] sm:$0xff]  ;;  %vm138_vm1 = vcmask 7168   ;;  %vm1814_vm2 = vcmask 1041409   ;;  %vm1816_vm3 = vcmask 1042434  }
  0x15   :  { %v2403_v6 = vpack.c.bf16 %v47_v5, %v46_v3  ;;  %v49_v8 = vld [vmem:[%s3459_s3 + $0x28] sm:$0xff]  ;;  %v50_v10 = vld [vmem:[%s3459_s3 + $0x30] sm:$0xff]  ;;  %v51_v11 = vld [vmem:[%s3459_s3 + $0x38] sm:$0xff]  ;;  %vm1818_vm4 = vcmask 1043459   ;;  %vm1820_vm5 = vcmask 1044484   ;;  %vm1822_vm6 = vcmask 1045509  }
  0x16   :  { %2400 = vmatprep.subr.bf16.mxu0 %v2399_v4  ;;  %v2407_v9 = vpack.c.bf16 %v49_v8, %v48_v7  ;;  %v42_v12 = vld [vmem:[%s3456_s0] sm:$0xff]  ;;  %v178_v14 = vld [vmem:[%s3460_s4 + $0x8] sm:$0xff]  ;;  %v179_v15 = vld [vmem:[%s3460_s4 + $0x10] sm:$0xff]  ;;  %v2411_v21 = vpack.c.bf16 %v51_v11, %v50_v10  ;;  %v2717_v7 = vmov 1966171168   ;;  %vm1824_vm7 = vcmask 1046534  }
  0x17   :  { %2402 = vmatpush3.bf16.msra.mxu0 %v2399_v4  ;;  %2246 = vmatprep.mubr.f32.mxu0 %v42_v12  ;;  %v177_v13 = vld [vmem:[%s3460_s4] sm:$0xff]  ;;  %v180_v17 = vld [vmem:[%s3460_s4 + $0x18] sm:$0xff]  ;;  %v182_v20 = vld [vmem:[%s3460_s4 + $0x28] sm:$0xff]  ;;  %v488_v8 = vunpack.c.l.s4 %v2717_v7  ;;  %vm1826_vm8 = vcmask 1047559   ;;  %vm2721_vm10 = vmmov 0  }
  0x18   :  { %2404 = vmatprep.subr.bf16.mxu0 %v2403_v6  ;;  %v2431_v16 = vpack.c.bf16 %v178_v14, %v177_v13  ;;  %v2435_v18 = vpack.c.bf16 %v180_v17, %v179_v15  ;;  %v181_v19 = vld [vmem:[%s3460_s4 + $0x20] sm:$0xff]  ;;  %v53_v23 = vld [vmem:[%s3459_s3 + $0x48] sm:$0xff]  ;;  %v183_v26 = vld [vmem:[%s3460_s4 + $0x30] sm:$0xff] }
  0x19   :  { %v52_v22 = vld [vmem:[%s3459_s3 + $0x40] sm:$0xff]  ;;  %v2439_v24 = vpack.c.bf16 %v182_v20, %v181_v19  ;;  %v184_v27 = vld [vmem:[%s3460_s4 + $0x38] sm:$0xff]  ;;  %v54_v29 = vld [vmem:[%s3459_s3 + $0x50] sm:$0xff]  ;;  %v489_v12 = vunpack.c.0.s8 %v488_v8 }
  0x1a   :  { %2432 = vmatprep.subr.bf16.mxu1 %v2431_v16  ;;  %v145_v25 = vld [vmem:[%s3457_s1] sm:$0xff]  ;;  %v2415_v28 = vpack.c.bf16 %v53_v23, %v52_v22  ;;  %v55_v30 = vld [vmem:[%s3459_s3 + $0x58] sm:$0xff]  ;;  %v2443_v31 = vpack.c.bf16 %v184_v27, %v183_v26  ;;  %v186_v33 = vld [vmem:[%s3460_s4 + $0x48] sm:$0xff] }
  0x1b   :  { %2406 = vmatpush3.bf16.msra.mxu0 %v2403_v6  ;;  %2434 = vmatpush3.bf16.msra.mxu1 %v2431_v16  ;;  %v185_v32 = vld [vmem:[%s3460_s4 + $0x40] sm:$0xff]  ;;  %v1561_v34 = vld [vmem:[%s3461_s5 + $0x8] sm:$0xff]  ;;  %v2419_v35 = vpack.c.bf16 %v55_v30, %v54_v29  ;;  %v1563_v39 = vld [vmem:[%s3461_s5 + $0x18] sm:$0xff] }
  0x1c   :  { %2408 = vmatprep.subr.bf16.mxu0 %v2407_v9  ;;  %2436 = vmatprep.subr.bf16.mxu1 %v2435_v18  ;;  %v1560_v36 = vld [vmem:[%s3461_s5] sm:$0xff]  ;;  %v57_v38 = vld [vmem:[%s3459_s3 + $0x68] sm:$0xff]  ;;  %v2447_v40 = vpack.c.bf16 %v186_v33, %v185_v32  ;;  %v1562_v41 = vld [vmem:[%s3461_s5 + $0x10] sm:$0xff] }
  0x1d   :  { %2281 = vmatprep.mubr.f32.mxu1 %v145_v25  ;;  %1571 = vperm.xlu1 %2522, %v1561_v34   ;;  %v56_v37 = vld [vmem:[%s3459_s3 + $0x60] sm:$0xff]  ;;  %v187_v42 = vld [vmem:[%s3460_s4 + $0x50] sm:$0xff]  ;;  %v188_v43 = vld [vmem:[%s3460_s4 + $0x58] sm:$0xff] }
  0x1e   :  { %1566 = vperm.xlu0 %2521, %v1560_v36   ;;  %v2423_v44 = vpack.c.bf16 %v57_v38, %v56_v37  ;;  %v58_v45 = vld [vmem:[%s3459_s3 + $0x70] sm:$0xff]  ;;  %v59_v46 = vld [vmem:[%s3459_s3 + $0x78] sm:$0xff]  ;;  %v2451_v47 = vpack.c.bf16 %v188_v43, %v187_v42  ;;  %v189_v48 = vld [vmem:[%s3460_s4 + $0x60] sm:$0xff] }
  0x1f   :  { %2410 = vmatpush3.bf16.msra.mxu0 %v2407_v9  ;;  %2438 = vmatpush3.bf16.msra.mxu1 %v2435_v18  ;;  %v190_v49 = vld [vmem:[%s3460_s4 + $0x68] sm:$0xff]  ;;  %v2427_v50 = vpack.c.bf16 %v59_v46, %v58_v45  ;;  %v191_v52 = vld [vmem:[%s3460_s4 + $0x70] sm:$0xff]  ;;  %v192_v53 = vld [vmem:[%s3460_s4 + $0x78] sm:$0xff]  ;;  %v490_v9 = vlaneseq }
  0x20   :  { %2412 = vmatprep.subr.bf16.mxu0 %v2411_v21  ;;  %2440 = vmatprep.subr.bf16.mxu1 %v2439_v24  ;;  %v2455_v51 = vpack.c.bf16 %v190_v49, %v189_v48  ;;  %v2459_v54 = vpack.c.bf16 %v192_v53, %v191_v52  ;;  %v43_v55 = vld [vmem:[%s3456_s0 + $0x8] sm:$0xff]  ;;  %v147_v57 = vld [vmem:[%s3457_s1 + $0x10] sm:$0xff]  ;;  %v148_v58 = vld [vmem:[%s3457_s1 + $0x18] sm:$0xff] }
  0x21   :  { %1581 = vperm.xlu1 %2522, %v1563_v39   ;;  %v146_v56 = vld [vmem:[%s3457_s1 + $0x8] sm:$0xff]  ;;  %v149_v59 = vld [vmem:[%s3457_s1 + $0x20] sm:$0xff]  ;;  %v151_v61 = vld [vmem:[%s3457_s1 + $0x30] sm:$0xff]  ;;  %v491_v13 = vshrl.u32 %v490_v9, 7 }
  0x22   :  { %1576 = vperm.xlu0 %2521, %v1562_v41   ;;  %v150_v60 = vld [vmem:[%s3457_s1 + $0x28] sm:$0xff]  ;;  %v152_v62 = vld [vmem:[%s3457_s1 + $0x38] sm:$0xff]  ;;  %v153_v63 = vld [vmem:[%s3457_s1 + $0x40] sm:$0xff] }
  0x23   :  { %2414 = vmatpush3.bf16.msra.mxu0 %v2411_v21  ;;  %2442 = vmatpush3.bf16.msra.mxu1 %v2439_v24  ;;  %v154_v0 = vld [vmem:[%s3457_s1 + $0x48] sm:$0xff]  ;;  %v155_v1 = vld [vmem:[%s3457_s1 + $0x50] sm:$0xff]  ;;  %v156_v2 = vld [vmem:[%s3457_s1 + $0x58] sm:$0xff]  ;;  %v492_v14 = vsub.s32 %v489_v12, %v491_v13 }
  0x24   :  { %2416 = vmatprep.subr.bf16.mxu0 %v2415_v28  ;;  %2444 = vmatprep.subr.bf16.mxu1 %v2443_v31  ;;  %v157_v3 = vld [vmem:[%s3457_s1 + $0x60] sm:$0xff]  ;;  %v158_v4 = vld [vmem:[%s3457_s1 + $0x68] sm:$0xff]  ;;  %v159_v5 = vld [vmem:[%s3457_s1 + $0x70] sm:$0xff] }
  0x25   :  { %v160_v6 = vld [vmem:[%s3457_s1 + $0x78] sm:$0xff]  ;;  %v163_v53 = vld [vmem:[%s3457_s1 + $0x90] sm:$0xff]  ;;  %v174_v7 = vld [vmem:[%s3457_s1 + $0xe8] sm:$0xff] }
  0x26   :  { %v175_v8 = vld [vmem:[%s3457_s1 + $0xf0] sm:$0xff] }
  0x27   :  { %2418 = vmatpush3.bf16.msra.mxu0 %v2415_v28  ;;  %2446 = vmatpush3.bf16.msra.mxu1 %v2443_v31 }
  0x28   :  { %2420 = vmatprep.subr.bf16.mxu0 %v2419_v35  ;;  %2448 = vmatprep.subr.bf16.mxu1 %v2447_v40 }
  0x2b   :  { %2422 = vmatpush3.bf16.msra.mxu0 %v2419_v35  ;;  %2450 = vmatpush3.bf16.msra.mxu1 %v2447_v40 }
  0x2c   :  { %2424 = vmatprep.subr.bf16.mxu0 %v2423_v44  ;;  %2452 = vmatprep.subr.bf16.mxu1 %v2451_v47 }
  0x2f   :  { %2426 = vmatpush3.bf16.msra.mxu0 %v2423_v44  ;;  %2454 = vmatpush3.bf16.msra.mxu1 %v2451_v47 }
  0x30   :  { %2428 = vmatprep.subr.bf16.mxu0 %v2427_v50  ;;  %2456 = vmatprep.subr.bf16.mxu1 %v2455_v51 }
  0x33   :  { %2430 = vmatpush3.bf16.msra.mxu0 %v2427_v50  ;;  %2458 = vmatpush3.bf16.msra.mxu1 %v2455_v51  ;;  %v161_v50 = vld [vmem:[%s3457_s1 + $0x80] sm:$0xff]  ;;  %v162_v51 = vld [vmem:[%s3457_s1 + $0x88] sm:$0xff] }
  0x34   :  { %2460 = vmatprep.subr.bf16.mxu1 %v2459_v54 }
  0x36   :  { %2247 = vmatmul.mubr.f32.vlgmr.msra.gmra.mrb[0].mxu0 %v43_v55 }
  0x37   :  { %2462 = vmatpush3.bf16.msra.mxu1 %v2459_v54 }
  0x3a   :  { %2282 = vmatmul.mubr.f32.vlgmr.msra.gmra.mrb[0].mxu1 %v146_v56  ;;  %v164_v56 = vld [vmem:[%s3457_s1 + $0x98] sm:$0xff] }
  0x3b   :  { %2284 = vmatprep.mubr.f32.mxu1 %v147_v57 }
  0x3e   :  { %2285 = vmatmul.mubr.f32.gmra.mrb[2].mxu1 %v148_v58  ;;  %v165_v58 = vld [vmem:[%s3457_s1 + $0xa0] sm:$0xff] }
  0x3f   :  { %2287 = vmatprep.mubr.f32.mxu1 %v149_v59  ;;  %v166_v59 = vld [vmem:[%s3457_s1 + $0xa8] sm:$0xff] }
  0x42   :  { %2288 = vmatmul.mubr.f32.gmra.mrb[4].mxu1 %v150_v60 }
  0x43   :  { %2290 = vmatprep.mubr.f32.mxu1 %v151_v61 }
  0x46   :  { %2291 = vmatmul.mubr.f32.gmra.mrb[6].mxu1 %v152_v62 }
  0x47   :  { %2293 = vmatprep.mubr.f32.mxu1 %v153_v63  ;;  %v167_v63 = vld [vmem:[%s3457_s1 + $0xb0] sm:$0xff] }
  0x4a   :  { %2294 = vmatmul.mubr.f32.gmra.mrb[8].mxu1 %v154_v0  ;;  %v168_v0 = vld [vmem:[%s3457_s1 + $0xb8] sm:$0xff] }
  0x4b   :  { %2296 = vmatprep.mubr.f32.mxu1 %v155_v1  ;;  %v169_v1 = vld [vmem:[%s3457_s1 + $0xc0] sm:$0xff] }
  0x4e   :  { %2297 = vmatmul.mubr.f32.gmra.mrb[10].mxu1 %v156_v2  ;;  %v170_v2 = vld [vmem:[%s3457_s1 + $0xc8] sm:$0xff] }
  0x4f   :  { %2299 = vmatprep.mubr.f32.mxu1 %v157_v3  ;;  %v171_v3 = vld [vmem:[%s3457_s1 + $0xd0] sm:$0xff] }
  0x52   :  { %2300 = vmatmul.mubr.f32.gmra.mrb[12].mxu1 %v158_v4  ;;  %v172_v4 = vld [vmem:[%s3457_s1 + $0xd8] sm:$0xff] }
  0x53   :  { %2302 = vmatprep.mubr.f32.mxu1 %v159_v5  ;;  %v173_v5 = vld [vmem:[%s3457_s1 + $0xe0] sm:$0xff] }
  0x56   :  { %2303 = vmatmul.mubr.f32.gmra.mrb[14].mxu1 %v160_v6 }
  0x57   :  { %2305 = vmatprep.mubr.f32.mxu1 %v161_v50 }
  0x5a   :  { %2306 = vmatmul.mubr.f32.gmra.mrb[16].mxu1 %v162_v51 }
  0x5b   :  { %2308 = vmatprep.mubr.f32.mxu1 %v163_v53 }
  0x5e   :  { %2309 = vmatmul.mubr.f32.gmra.mrb[18].mxu1 %v164_v56 }
  0x5f   :  { %2311 = vmatprep.mubr.f32.mxu1 %v165_v58 }
  0x62   :  { %2312 = vmatmul.mubr.f32.gmra.mrb[20].mxu1 %v166_v59 }
  0x63   :  { %2314 = vmatprep.mubr.f32.mxu1 %v167_v63 }
  0x66   :  { %2315 = vmatmul.mubr.f32.gmra.mrb[22].mxu1 %v168_v0 }
  0x67   :  { %2317 = vmatprep.mubr.f32.mxu1 %v169_v1 }
  0x6a   :  { %2318 = vmatmul.mubr.f32.gmra.mrb[24].mxu1 %v170_v2 }
  0x6b   :  { %2320 = vmatprep.mubr.f32.mxu1 %v171_v3 }
  0x6e   :  { %2321 = vmatmul.mubr.f32.gmra.mrb[26].mxu1 %v172_v4 }
  0x6f   :  { %2323 = vmatprep.mubr.f32.mxu1 %v173_v5 }
  0x72   :  { %2324 = vmatmul.mubr.f32.gmra.mrb[28].mxu1 %v174_v7 }
  0x73   :  { %2326 = vmatprep.mubr.f32.mxu1 %v175_v8 }
  0x9c   :  { %v3026_v12 = vpop.permute.xlu1 %1571 }
  0xa0   :  { %v3029_v13 = vpop.permute.xlu1 %1581 }
 0x109   :  { %v2248_v10 = vpop.f32.mrb[0].mxu0 }
 0x10a   :  { %137 = vst.msk [vmem:[#allocation2 + $0x8] sm:$0xff] %vm135_vm0, %v2248_v10  ;;  %v126_v11 = vpop.f32.mrb[1].mxu0  ;;  %v176_v10 = vld [vmem:[%s3457_s1 + $0xf8] sm:$0xff]  ;;  %s2722_s1 = smov [#allocation9]  }
 0x10b   :  { %136 = vst.msk [vmem:[#allocation2] sm:$0xff] %vm135_vm0, %v126_v11  ;;  %2327 = vmatmul.mubr.f32.gmra.mrb[30].mxu1 %v176_v10  ;;  %s2102_s23 = sshll.u32 %s2722_s1, 4  ;;  %s2103_s23 = int_to_ptr.vmem [resolvable:$true] %s2102_s23 }
 0x10c   :  { %s2687_s24 = scalar_lea.vmem %s2103_s23, 256  ;;  %p2692_p9 = scmp.lt.s32.totalorder %s2103_s23, %s2103_s23 }
 0x10d   :  { %v2936_v15 = vpop.f32.mrb[0].mxu1  ;;  %p2688_p8 = scmp.ne.s32.totalorder %s2103_s23, %s2687_s24  ;;  %p2693_p10 = scmp.lt.s32.totalorder %s2687_s24, %s2687_s24 }
 0x10e   :  { %v2938_v16 = vpop.f32.mrb[1].mxu1 }
 0x10f   :  { %p2694_p11 = por %p2693_p10, %p2692_p9 }
 0x111   :  { %v483_v17 = vld [vmem:[#allocation2 + $0x8] sm:$0xff]  ;;  %v2940_v19 = vpop.f32.mrb[2].mxu1  ;;  %p2695_p12 = pnand %p2694_p11, %p2688_p8 }
 0x112   :  { %v542_v18 = vrot.slane %v483_v17, %v492_v14  ;;  %v2942_v22 = vpop.f32.mrb[3].mxu1  ;;  %v482_v26 = vld [vmem:[#allocation2] sm:$0xff]  ;;  %v535_v35 = vcombine.high %v483_v17, %v483_v17 }
 0x113   :  { %v493_v29 = vrot.slane %v482_v26, %v492_v14  ;;  %v486_v45 = vcombine.high %v482_v26, %v482_v26 }
 0x114   :  { %v558_v20 = vrot.slane %v542_v18, %v492_v14  ;;  %v550_v21 = vcombine.high %v542_v18, %v542_v18  ;;  %v549_v38 = vrot.slane %v535_v35, %v492_v14 }
 0x115   :  { %v2944_v24 = vpop.f32.mrb[4].mxu1  ;;  %v509_v32 = vrot.slane %v493_v29, %v492_v14  ;;  %v500_v46 = vrot.slane %v486_v45, %v492_v14  ;;  %v501_v52 = vcombine.high %v493_v29, %v493_v29 }
 0x116   :  { %856 = vxpose.xlu1.b32.start.end [1/1] (short) (narrow) %v558_v20, 32  ;;  %v572_v23 = vrot.slane %v550_v21, %v492_v14  ;;  %v2946_v25 = vpop.f32.mrb[5].mxu1  ;;  %v551_v41 = vcombine.high %v549_v38, %v549_v38  ;;  %v580_v43 = vcombine.high %v558_v20, %v558_v20  ;;  %v565_v48 = vrot.slane %v549_v38, %v492_v14 }
 0x117   :  { %v516_v47 = vrot.slane %v500_v46, %v492_v14  ;;  %v523_v54 = vrot.slane %v501_v52, %v492_v14  ;;  %v502_v57 = vcombine.high %v500_v46, %v500_v46  ;;  %v531_v61 = vcombine.high %v509_v32, %v509_v32 }
 0x118   :  { %888 = vxpose.xlu0.b32.start.end [1/1] (short) (narrow) %v572_v23, 32  ;;  %v582_v33 = vcombine.high %v572_v23, %v572_v23  ;;  %v579_v44 = vrot.slane %v551_v41, %v492_v14  ;;  %v581_v6 = vcombine.high %v565_v48, %v565_v48 }
 0x119   :  { %v2948_v27 = vpop.f32.mrb[6].mxu1  ;;  %v532_v49 = vcombine.high %v516_v47, %v516_v47  ;;  %v530_v60 = vrot.slane %v502_v57, %v492_v14  ;;  %v533_v11 = vcombine.high %v523_v54, %v523_v54 }
 0x11a   :  { %v2950_v28 = vpop.f32.mrb[7].mxu1  ;;  %v583_v55 = vcombine.high %v579_v44, %v579_v44 }
 0x11b   :  { %v534_v62 = vcombine.high %v530_v60, %v530_v60 }
 0x11d   :  { %v2952_v30 = vpop.f32.mrb[8].mxu1 }
 0x11e   :  { %v2954_v31 = vpop.f32.mrb[9].mxu1 }
 0x121   :  { %v2956_v34 = vpop.f32.mrb[10].mxu1 }
 0x122   :  { %v2958_v36 = vpop.f32.mrb[11].mxu1 }
 0x123   :  { %600 = vxpose.xlu1.b32.start.end [1/1] (short) (narrow) %v509_v32, 32 }
 0x125   :  { %952 = vxpose.xlu0.b32.start.end [1/1] (short) (narrow) %v582_v33, 32  ;;  %v2960_v37 = vpop.f32.mrb[12].mxu1 }
 0x126   :  { %v2962_v39 = vpop.f32.mrb[13].mxu1 }
 0x129   :  { %v2964_v40 = vpop.f32.mrb[14].mxu1 }
 0x12a   :  { %v2966_v42 = vpop.f32.mrb[15].mxu1 }
 0x12d   :  { %v3086_v0 = vpop.f32.mrb[16].mxu1 }
 0x12e   :  { %v3088_v2 = vpop.f32.mrb[17].mxu1 }
 0x130   :  { %920 = vxpose.xlu1.b32.start.end [1/1] (short) (narrow) %v580_v43, 32 }
 0x132   :  { %1016 = vxpose.xlu0.b32.start.end [1/1] (short) (narrow) %v579_v44, 32 }
 0x13d   :  { %984 = vxpose.xlu1.b32.start.end [1/1] (short) (narrow) %v565_v48, 32 }
 0x13f   :  { %792 = vxpose.xlu0.b32.start.end [1/1] (short) (narrow) %v532_v49, 32 }
 0x14a   :  { %632 = vxpose.xlu1.b32.start.end [1/1] (short) (narrow) %v523_v54, 32 }
 0x14c   :  { %1080 = vxpose.xlu0.b32.start.end [1/1] (short) (narrow) %v583_v55, 32 }
 0x157   :  { %664 = vxpose.xlu1.b32.start.end [1/1] (short) (narrow) %v531_v61, 32 }
 0x159   :  { %824 = vxpose.xlu0.b32.start.end [1/1] (short) (narrow) %v534_v62, 32 }
 0x164   :  { %728 = vxpose.xlu1.b32.start.end [1/1] (short) (narrow) %v516_v47, 32 }
 0x166   :  { %418 = vxpose.xlu0.b32.start [1/16] (narrow) %v2938_v16, 32  ;;  %v3034_v16 = vpop.permute.xlu0 %1566 }
 0x16a   :  { %419 = vxpose.xlu0.b32.cont [2/16] (narrow) %v2936_v15, 32 }
 0x16e   :  { %420 = vxpose.xlu0.b32.cont [3/16] (narrow) %v2942_v22, 32 }
 0x171   :  { %1048 = vxpose.xlu1.b32.start.end [1/1] (short) (narrow) %v581_v6, 32  ;;  %v3092_v6 = vpop.f32.mrb[18].mxu1 }
 0x172   :  { %421 = vxpose.xlu0.b32.cont [4/16] (narrow) %v2940_v19, 32  ;;  %v3042_v19 = vpop.permute.xlu0 %1576  ;;  %v3094_v7 = vpop.f32.mrb[19].mxu1 }
 0x176   :  { %422 = vxpose.xlu0.b32.cont [5/16] (narrow) %v2946_v25, 32 }
 0x17a   :  { %423 = vxpose.xlu0.b32.cont [6/16] (narrow) %v2944_v24, 32 }
 0x17e   :  { %696 = vxpose.xlu1.b32.start.end [1/1] (short) (narrow) %v533_v11, 32  ;;  %424 = vxpose.xlu0.b32.cont [7/16] (narrow) %v2950_v28, 32 }
 0x182   :  { %425 = vxpose.xlu0.b32.cont [8/16] (narrow) %v2948_v27, 32 }
 0x186   :  { %426 = vxpose.xlu0.b32.cont [9/16] (narrow) %v2954_v31, 32 }
 0x18a   :  { %427 = vxpose.xlu0.b32.cont [10/16] (narrow) %v2952_v30, 32 }
 0x18b   :  { %760 = vxpose.xlu1.b32.start.end [1/1] (short) (narrow) %v530_v60, 32 }
 0x18e   :  { %428 = vxpose.xlu0.b32.cont [11/16] (narrow) %v2958_v36, 32 }
 0x192   :  { %429 = vxpose.xlu0.b32.cont [12/16] (narrow) %v2956_v34, 32 }
 0x196   :  { %v872_v14 = vpop.trf.xlu1  ;;  %430 = vxpose.xlu0.b32.cont [13/16] (narrow) %v2962_v39, 32 }
 0x198   :  { %v904_v21 = vpop.trf.xlu0 }
 0x19a   :  { %v873_v15 = vpop.trf.xlu1  ;;  %431 = vxpose.xlu0.b32.cont [14/16] (narrow) %v2960_v37, 32 }
 0x19c   :  { %v905_v24 = vpop.trf.xlu0 }
 0x19e   :  { %v3036_v17 = vpop.trf.xlu1  ;;  %432 = vxpose.xlu0.b32.cont [15/16] (narrow) %v2966_v42, 32 }
 0x1a0   :  { %v3046_v26 = vpop.trf.xlu0 }
 0x1a2   :  { %v3039_v18 = vpop.trf.xlu1  ;;  %433 = vxpose.xlu0.b32.end [16/16] (narrow) %v2964_v40, 32 }
 0x1a4   :  { %v3048_v29 = vpop.trf.xlu0 }
 0x1a6   :  { %v616_v20 = vpop.trf.xlu1 }
 0x1a8   :  { %v968_v31 = vpop.trf.xlu0 }
 0x1aa   :  { %v617_v22 = vpop.trf.xlu1 }
 0x1ac   :  { %v969_v34 = vpop.trf.xlu0 }
 0x1ae   :  { %v618_v23 = vpop.trf.xlu1 }
 0x1b0   :  { %v3056_v36 = vpop.trf.xlu0 }
 0x1b2   :  { %v3044_v25 = vpop.trf.xlu1 }
 0x1b4   :  { %v3062_v39 = vpop.trf.xlu0 }
 0x1b5   :  { %1114 = vperm.xlu1 %2522, %v616_v20  }
 0x1b6   :  { %v936_v27 = vpop.trf.xlu1 }
 0x1b8   :  { %v1032_v41 = vpop.trf.xlu0 }
 0x1ba   :  { %v937_v28 = vpop.trf.xlu1 }
 0x1bc   :  { %v3070_v49 = vpop.trf.xlu0 }
 0x1be   :  { %v3050_v30 = vpop.trf.xlu1 }
 0x1c0   :  { %v3072_v51 = vpop.trf.xlu0 }
 0x1c2   :  { %v3052_v32 = vpop.trf.xlu1 }
 0x1c4   :  { %v3074_v54 = vpop.trf.xlu0 }
 0x1c6   :  { %v1000_v33 = vpop.trf.xlu1 }
 0x1c7   :  { %1354 = vperm.xlu1 %2522, %v1000_v33  }
 0x1c8   :  { %v808_v56 = vpop.trf.xlu0 }
 0x1ca   :  { %v3054_v35 = vpop.trf.xlu1 }
 0x1cb   :  { %1274 = vperm.xlu0 %2521, %v872_v14   ;;  %v3098_v14 = vpop.f32.mrb[20].mxu1 }
 0x1cc   :  { %v809_v59 = vpop.trf.xlu0 }
 0x1ce   :  { %v3058_v37 = vpop.trf.xlu1 }
 0x1cf   :  { %1294 = vperm.xlu0 %2521, %v904_v21  }
 0x1d0   :  { %v810_v61 = vpop.trf.xlu0 }
 0x1d2   :  { %v3060_v38 = vpop.trf.xlu1 }
 0x1d3   :  { %1314 = vperm.xlu0 %2521, %v936_v27  }
 0x1d4   :  { %v811_v1 = vpop.trf.xlu0 }
 0x1d6   :  { %v648_v40 = vpop.trf.xlu1 }
 0x1d7   :  { %1134 = vperm.xlu1 %2522, %v648_v40   ;;  %1334 = vperm.xlu0 %2521, %v968_v31  }
 0x1d8   :  { %v3090_v4 = vpop.trf.xlu0 }
 0x1da   :  { %v649_v42 = vpop.trf.xlu1 }
 0x1db   :  { %1374 = vperm.xlu0 %2521, %v1032_v41  }
 0x1dc   :  { %v3096_v10 = vpop.trf.xlu0 }
 0x1de   :  { %v650_v43 = vpop.trf.xlu1 }
 0x1df   :  { %1119 = vperm.xlu0 %2521, %v617_v22  }
 0x1e0   :  { %v3102_v20 = vpop.trf.xlu0 }
 0x1e2   :  { %v3064_v44 = vpop.trf.xlu1 }
 0x1e6   :  { %v680_v45 = vpop.trf.xlu1 }
 0x1e7   :  { %1154 = vperm.xlu1 %2522, %v680_v45  }
 0x1ea   :  { %v681_v46 = vpop.trf.xlu1 }
 0x1ee   :  { %v3066_v47 = vpop.trf.xlu1 }
 0x1f2   :  { %v3068_v48 = vpop.trf.xlu1 }
 0x1f6   :  { %v744_v50 = vpop.trf.xlu1 }
 0x1f7   :  { %1194 = vperm.xlu1 %2522, %v744_v50  }
 0x1fa   :  { %v745_v52 = vpop.trf.xlu1 }
 0x1fb   :  { %1279 = vperm.xlu1 %2522, %v873_v15   ;;  %v3100_v15 = vpop.f32.mrb[21].mxu1 }
 0x1fc   :  { %v3105_v22 = vpop.f32.mrb[22].mxu1 }
 0x1fe   :  { %v746_v53 = vpop.trf.xlu1 }
 0x1ff   :  { %1299 = vperm.xlu1 %2522, %v905_v24   ;;  %v3109_v24 = vpop.f32.mrb[23].mxu1 }
 0x202   :  { %v3076_v55 = vpop.trf.xlu1 }
 0x203   :  { %1319 = vperm.xlu1 %2522, %v937_v28   ;;  %v3112_v28 = vpop.f32.mrb[24].mxu1 }
 0x204   :  { %v3114_v31 = vpop.f32.mrb[25].mxu1 }
 0x206   :  { %v3078_v57 = vpop.trf.xlu1 }
 0x207   :  { %1139 = vperm.xlu1 %2522, %v649_v42  }
 0x20a   :  { %v3080_v58 = vpop.trf.xlu1 }
 0x20b   :  { %1159 = vperm.xlu1 %2522, %v681_v46  }
 0x20e   :  { %v3082_v60 = vpop.trf.xlu1 }
 0x20f   :  { %1339 = vperm.xlu1 %2522, %v969_v34   ;;  %v3118_v34 = vpop.f32.mrb[26].mxu1 }
 0x212   :  { %v3084_v62 = vpop.trf.xlu1 }
 0x213   :  { %1124 = vperm.xlu1 %2522, %v618_v23   ;;  %v3107_v23 = vpop.trf.xlu0 }
 0x216   :  { %v712_v63 = vpop.trf.xlu1 }
 0x217   :  { %1174 = vperm.xlu0 %2521, %v712_v63   ;;  %v840_v27 = vpop.trf.xlu0 }
 0x21a   :  { %v713_v3 = vpop.trf.xlu1 }
 0x21b   :  { %1179 = vperm.xlu1 %2522, %v713_v3   ;;  %v841_v33 = vpop.trf.xlu0 }
 0x21e   :  { %v714_v5 = vpop.trf.xlu1 }
 0x222   :  { %v715_v8 = vpop.trf.xlu1 }
 0x226   :  { %v776_v11 = vpop.trf.xlu1 }
 0x227   :  { %1214 = vperm.xlu0 %2521, %v776_v11  }
 0x22a   :  { %v777_v21 = vpop.trf.xlu1 }
 0x22b   :  { %1219 = vperm.xlu1 %2522, %v777_v21   ;;  %1234 = vperm.xlu0 %2521, %v808_v56  }
 0x22f   :  { %1239 = vperm.xlu1 %2522, %v809_v59   ;;  %1359 = vperm.xlu0 %2521, %v3054_v35   ;;  %v3120_v35 = vpop.f32.mrb[27].mxu1 }
 0x233   :  { %1304 = vperm.xlu1 %2522, %v3046_v26   ;;  %1199 = vperm.xlu0 %2521, %v745_v52   ;;  %v3126_v26 = vpop.f32.mrb[28].mxu1 }
 0x234   :  { %v3128_v40 = vpop.f32.mrb[29].mxu1 }
 0x237   :  { %1144 = vperm.xlu1 %2522, %v650_v43   ;;  %1254 = vperm.xlu0 %2521, %v840_v27  }
 0x23b   :  { %1204 = vperm.xlu1 %2522, %v746_v53   ;;  %1284 = vperm.xlu0 %2521, %v3036_v17   ;;  %v3133_v17 = vpop.f32.mrb[30].mxu1 }
 0x23f   :  { %1324 = vperm.xlu0 %2521, %v3050_v30   ;;  %1259 = vperm.xlu1 %2522, %v841_v33   ;;  %v3135_v30 = vpop.f32.mrb[31].mxu1 }
 0x243   :  { %1164 = vperm.xlu0 %2521, %v3066_v47   ;;  %1289 = vperm.xlu1 %2522, %v3039_v18   ;;  %v778_v18 = vpop.trf.xlu1 }
 0x247   :  { %1309 = vperm.xlu0 %2521, %v3048_v29   ;;  %1344 = vperm.xlu1 %2522, %v3056_v36   ;;  %v842_v29 = vpop.trf.xlu0  ;;  %v779_v36 = vpop.trf.xlu1 }
 0x24b   :  { %1149 = vperm.xlu0 %2521, %v3064_v44   ;;  %1129 = vperm.xlu1 %2522, %v3044_v25   ;;  %v843_v41 = vpop.trf.xlu0  ;;  %v1115_v25 = vpop.permute.xlu1 %1114 }
 0x24f   :  { %1169 = vperm.xlu0 %2521, %v3068_v48   ;;  %1184 = vperm.xlu1 %2522, %v714_v5   ;;  %v3142_v42 = vpop.trf.xlu0  ;;  %v3146_v43 = vpop.permute.xlu1 %1354 }
 0x253   :  { %1209 = vperm.xlu0 %2521, %v3076_v55   ;;  %1224 = vperm.xlu1 %2522, %v778_v18   ;;  %v3148_v44 = vpop.trf.xlu0 }
 0x257   :  { %1189 = vperm.xlu0 %2521, %v715_v8   ;;  %1244 = vperm.xlu1 %2522, %v810_v61   ;;  %v1432_v8 = vadd.f32 %v1115_v25, %v3142_v42 }
 0x259   :  { %2525 = vtanh.f32 %v1432_v8 }
 0x25b   :  { %1229 = vperm.xlu0 %2521, %v779_v36   ;;  %1264 = vperm.xlu1 %2522, %v842_v29  }
 0x25f   :  { %1249 = vperm.xlu0 %2521, %v811_v1   ;;  %1269 = vperm.xlu1 %2522, %v843_v41  }
 0x263   :  { %1329 = vperm.xlu0 %2521, %v3052_v32   ;;  %1379 = vperm.xlu1 %2522, %v3070_v49   ;;  %v1135_v32 = vpop.permute.xlu1 %1134  ;;  %v2526_v25 = vpop.eup %2525 }
 0x267   :  { %1394 = vperm.xlu0 %2521, %v3078_v57   ;;  %1364 = vperm.xlu1 %2522, %v3058_v37   ;;  %v3154_v37 = vpop.trf.xlu0  ;;  %v1155_v45 = vpop.permute.xlu1 %1154 }
 0x26b   :  { %1349 = vperm.xlu0 %2521, %v3062_v39   ;;  %1399 = vperm.xlu1 %2522, %v3080_v58   ;;  %v3158_v46 = vpop.trf.xlu0 }
 0x26f   :  { %1414 = vperm.xlu0 %2521, %v3090_v4   ;;  %1384 = vperm.xlu1 %2522, %v3072_v51  }
 0x273   :  { %1369 = vperm.xlu0 %2521, %v3060_v38   ;;  %1419 = vperm.xlu1 %2522, %v3096_v10   ;;  %v3165_v38 = vpop.permute.xlu0 %1274  ;;  %v1436_v10 = vadd.f32 %v1135_v32, %v3142_v42 }
 0x275   :  { %2527 = vtanh.f32 %v1436_v10 }
 0x276   :  { %v1195_v39 = vpop.permute.xlu1 %1194 }
 0x277   :  { %1389 = vperm.xlu0 %2521, %v3074_v54   ;;  %1404 = vperm.xlu1 %2522, %v3082_v60   ;;  %v3169_v49 = vpop.permute.xlu0 %1294  ;;  %v1448_v21 = vadd.f32 %v1195_v39, %v3142_v42 }
 0x27a   :  { %v3162_v47 = vpop.permute.xlu1 %1279 }
 0x27b   :  { %1409 = vperm.xlu0 %2521, %v3084_v62   ;;  %1424 = vperm.xlu1 %2522, %v3102_v20   ;;  %v3173_v51 = vpop.permute.xlu0 %1314  ;;  %v1440_v20 = vadd.f32 %v1155_v45, %v3142_v42 }
 0x27e   :  { %v3167_v48 = vpop.permute.xlu1 %1299 }
 0x27f   :  { %1429 = vperm.xlu1 %2522, %v3107_v23   ;;  %v3175_v53 = vpop.permute.xlu0 %1334  ;;  %v2528_v45 = vpop.eup %2527 }
 0x282   :  { %v3171_v50 = vpop.permute.xlu1 %1319 }
 0x283   :  { %v3177_v55 = vpop.permute.xlu0 %1374 }
 0x286   :  { %v1140_v52 = vpop.permute.xlu1 %1139 }
 0x287   :  { %v1120_v57 = vpop.permute.xlu0 %1119 }
 0x288   :  { %v1433_v11 = vadd.f32 %v1120_v57, %v3148_v44 }
 0x28a   :  { %v1160_v54 = vpop.permute.xlu1 %1159  ;;  %2529 = vtanh.f32 %v1433_v11 }
 0x28b   :  { %2531 = vtanh.f32 %v1440_v20 }
 0x28c   :  { %2533 = vtanh.f32 %v1448_v21 }
 0x28e   :  { %v3180_v56 = vpop.permute.xlu1 %1339 }
 0x292   :  { %v1125_v58 = vpop.permute.xlu1 %1124 }
 0x293   :  { %v1434_v23 = vadd.f32 %v1125_v58, %v3154_v37 }
 0x294   :  { %v2530_v57 = vpop.eup %2529 }
 0x295   :  { %v1585_v20 = vmul.f32 %v2530_v57, %v3026_v12 }
 0x296   :  { %v1175_v59 = vpop.permute.xlu0 %1174 }
 0x297   :  { %v1444_v33 = vadd.f32 %v1175_v59, %v3142_v42  ;;  %v2532_v59 = vpop.eup %2531 }
 0x299   :  { %450 = vxpose.xlu0.b32.start [1/16] (narrow) %v3088_v2, 32 }
 0x29a   :  { %v1180_v60 = vpop.permute.xlu1 %1179 }
 0x29d   :  { %451 = vxpose.xlu0.b32.cont [2/16] (narrow) %v3086_v0, 32 }
 0x2a1   :  { %452 = vxpose.xlu0.b32.cont [3/16] (narrow) %v3094_v7, 32 }
 0x2a5   :  { %453 = vxpose.xlu0.b32.cont [4/16] (narrow) %v3092_v6, 32 }
 0x2a6   :  { %v1215_v61 = vpop.permute.xlu0 %1214 }
 0x2a7   :  { %v1452_v58 = vadd.f32 %v1215_v61, %v3142_v42 }
 0x2a9   :  { %454 = vxpose.xlu0.b32.cont [5/16] (narrow) %v3100_v15, 32 }
 0x2aa   :  { %v1220_v62 = vpop.permute.xlu1 %1219  ;;  %v3186_v63 = vpop.permute.xlu0 %1234 }
 0x2ab   :  { %v1456_v61 = vadd.f32 %v3186_v63, %v3142_v42 }
 0x2ad   :  { %455 = vxpose.xlu0.b32.cont [6/16] (narrow) %v3098_v14, 32 }
 0x2ae   :  { %v3189_v1 = vpop.permute.xlu1 %1239  ;;  %v3191_v2 = vpop.permute.xlu0 %1359 }
 0x2b1   :  { %456 = vxpose.xlu0.b32.cont [7/16] (narrow) %v3109_v24, 32 }
 0x2b2   :  { %v3194_v0 = vpop.permute.xlu1 %1304  ;;  %v1200_v3 = vpop.permute.xlu0 %1199 }
 0x2b3   :  { %v1449_v36 = vadd.f32 %v1200_v3, %v3148_v44 }
 0x2b5   :  { %457 = vxpose.xlu0.b32.cont [8/16] (narrow) %v3105_v22, 32  ;;  %v1437_v22 = vadd.f32 %v1140_v52, %v3148_v44 }
 0x2b6   :  { %v1145_v4 = vpop.permute.xlu1 %1144  ;;  %v3197_v5 = vpop.permute.xlu0 %1254 }
 0x2b7   :  { %2535 = vtanh.f32 %v1437_v22  ;;  %v1584_v22 = vmul.f32 %v2526_v25, %v3034_v16 }
 0x2b8   :  { %2537 = vtanh.f32 %v1434_v23 }
 0x2b9   :  { %458 = vxpose.xlu0.b32.cont [9/16] (narrow) %v3114_v31, 32  ;;  %v1438_v31 = vadd.f32 %v1145_v4, %v3154_v37  ;;  %v1648_v25 = vadd.f32 %v1585_v20, %v1584_v22 }
 0x2ba   :  { %v1205_v6 = vpop.permute.xlu1 %1204  ;;  %v3200_v7 = vpop.permute.xlu0 %1284 }
 0x2bb   :  { %v1450_v39 = vadd.f32 %v1205_v6, %v3154_v37 }
 0x2bd   :  { %459 = vxpose.xlu0.b32.cont [10/16] (narrow) %v3112_v28, 32  ;;  %v1441_v28 = vadd.f32 %v1160_v54, %v3148_v44 }
 0x2be   :  { %v3206_v14 = vpop.permute.xlu1 %1259  ;;  %v3208_v15 = vpop.permute.xlu0 %1324 }
 0x2bf   :  { %2539 = vtanh.f32 %v1441_v28 }
 0x2c0   :  { %2541 = vtanh.f32 %v1438_v31 }
 0x2c1   :  { %460 = vxpose.xlu0.b32.cont [11/16] (narrow) %v3120_v35, 32  ;;  %v1445_v35 = vadd.f32 %v1180_v60, %v3148_v44  ;;  %2543 = vtanh.f32 %v1444_v33  ;;  %v1453_v60 = vadd.f32 %v1220_v62, %v3148_v44 }
 0x2c2   :  { %v3215_v24 = vpop.permute.xlu1 %1289  ;;  %v1165_v27 = vpop.permute.xlu0 %1164 }
 0x2c3   :  { %v1442_v41 = vadd.f32 %v1165_v27, %v3154_v37  ;;  %2545 = vtanh.f32 %v1445_v35 }
 0x2c4   :  { %2547 = vtanh.f32 %v1449_v36  ;;  %v1460_v36 = vadd.f32 %v3197_v5, %v3142_v42 }
 0x2c5   :  { %461 = vxpose.xlu0.b32.cont [12/16] (narrow) %v3118_v34, 32  ;;  %2549 = vtanh.f32 %v1442_v41 }
 0x2c6   :  { %v3222_v18 = vpop.permute.xlu1 %1344  ;;  %v3224_v29 = vpop.permute.xlu0 %1309 }
 0x2c9   :  { %462 = vxpose.xlu0.b32.cont [13/16] (narrow) %v3128_v40, 32  ;;  %v3235_v40 = vpop.eup %2533 }
 0x2ca   :  { %v1130_v32 = vpop.permute.xlu1 %1129  ;;  %v1150_v34 = vpop.permute.xlu0 %1149 }
 0x2cb   :  { %v1435_v52 = vadd.f32 %v1130_v32, %v3158_v46  ;;  %v1439_v54 = vadd.f32 %v1150_v34, %v3158_v46  ;;  %v2536_v6 = vpop.eup %2535  ;;  %v1461_v34 = vadd.f32 %v3206_v14, %v3148_v44 }
 0x2cc   :  { %v2538_v11 = vpop.eup %2537  ;;  %v1589_v23 = vmul.f32 %v2536_v6, %v3026_v12 }
 0x2cd   :  { %2551 = vtanh.f32 %v1435_v52  ;;  %463 = vxpose.xlu0.b32.cont [14/16] (narrow) %v3126_v26, 32  ;;  %v2540_v62 = vpop.eup %2539  ;;  %v1457_v26 = vadd.f32 %v3189_v1, %v3148_v44  ;;  %v1586_v63 = vmul.f32 %v2538_v11, %v3042_v19  ;;  %v1592_v52 = vmul.f32 %v2532_v59, %v3034_v16 }
 0x2ce   :  { %2553 = vtanh.f32 %v1439_v54  ;;  %v1185_v3 = vpop.permute.xlu1 %1184  ;;  %v1170_v4 = vpop.permute.xlu0 %1169 }
 0x2cf   :  { %2555 = vtanh.f32 %v1450_v39  ;;  %v1446_v8 = vadd.f32 %v1185_v3, %v3154_v37  ;;  %v1443_v10 = vadd.f32 %v1170_v4, %v3158_v46  ;;  %v2542_v21 = vpop.eup %2541  ;;  %v1649_v5 = vadd.f32 %v1648_v25, %v1586_v63 }
 0x2d0   :  { %2557 = vtanh.f32 %v1452_v58  ;;  %v3247_v31 = vpop.eup %2543  ;;  %v1590_v32 = vmul.f32 %v2542_v21, %v3042_v19  ;;  %v1600_v63 = vmul.f32 %v3235_v40, %v3034_v16 }
 0x2d1   :  { %2559 = vtanh.f32 %v1453_v60  ;;  %464 = vxpose.xlu0.b32.cont [15/16] (narrow) %v3135_v30, 32  ;;  %v2546_v1 = vpop.eup %2545  ;;  %v1588_v30 = vmul.f32 %v2528_v45, %v3034_v16  ;;  %v1593_v45 = vmul.f32 %v2540_v62, %v3026_v12 }
 0x2d2   :  { %2561 = vtanh.f32 %v1443_v10  ;;  %v1225_v27 = vpop.permute.xlu1 %1224  ;;  %v1210_v28 = vpop.permute.xlu0 %1209 }
 0x2d3   :  { %2563 = vtanh.f32 %v1446_v8  ;;  %v1454_v33 = vadd.f32 %v1225_v27, %v3154_v37  ;;  %v1451_v35 = vadd.f32 %v1210_v28, %v3158_v46  ;;  %v2548_v41 = vpop.eup %2547  ;;  %v1657_v54 = vadd.f32 %v1589_v23, %v1588_v30 }
 0x2d4   :  { %2565 = vtanh.f32 %v1456_v61  ;;  %v2550_v39 = vpop.eup %2549  ;;  %v2718_v8 = vmov -inf   ;;  %v1666_v11 = vadd.f32 %v1593_v45, %v1592_v52  ;;  %v1601_v61 = vmul.f32 %v2548_v41, %v3026_v12 }
 0x2d5   :  { %2567 = vtanh.f32 %v1457_v26  ;;  %465 = vxpose.xlu0.b32.end [16/16] (narrow) %v3133_v17, 32  ;;  %v1658_v14 = vadd.f32 %v1657_v54, %v1590_v32  ;;  %v1594_v59 = vmul.f32 %v2550_v39, %v3042_v19  ;;  %139 = vst.msk [vmem:[#allocation3] sm:$0xff] %vm138_vm1, %v2718_v8  ;;  %140 = vst.msk [vmem:[#allocation3 + $0x8] sm:$0xff] %vm138_vm1, %v2718_v8 }
 0x2d6   :  { %2569 = vtanh.f32 %v1451_v35  ;;  %v1245_v57 = vpop.permute.xlu1 %1244  ;;  %v1190_v58 = vpop.permute.xlu0 %1189  ;;  %v1684_v39 = vadd.f32 %v1601_v61, %v1600_v63 }
 0x2d7   :  { %v2552_v42 = vpop.eup %2551  ;;  %2571 = vtanh.f32 %v1454_v33  ;;  %v1458_v60 = vadd.f32 %v1245_v57, %v3154_v37  ;;  %v1447_v3 = vadd.f32 %v1190_v58, %v3158_v46 }
 0x2d8   :  { %v2554_v4 = vpop.eup %2553  ;;  %2573 = vtanh.f32 %v1460_v36  ;;  %v1587_v17 = vmul.f32 %v2552_v42, %v3029_v13  ;;  %v1667_v36 = vadd.f32 %v1666_v11, %v1594_v59 }
 0x2d9   :  { %v2556_v44 = vpop.eup %2555  ;;  %2575 = vtanh.f32 %v1461_v34  ;;  %v1591_v6 = vmul.f32 %v2554_v4, %v3029_v13  ;;  %v1597_v34 = vmul.f32 %v2546_v1, %v3026_v12 }
 0x2da   :  { %v2558_v10 = vpop.eup %2557  ;;  %v1650_v62 = vadd.f32 %v1649_v5, %v1587_v17  ;;  %2577 = vtanh.f32 %v1447_v3  ;;  %v1265_v20 = vpop.permute.xlu1 %1264  ;;  %v1602_v33 = vmul.f32 %v2556_v44, %v3042_v19 }
 0x2db   :  { %v1230_v26 = vpop.permute.xlu0 %1229  ;;  %v2560_v21 = vpop.eup %2559  ;;  %v1659_v22 = vadd.f32 %v1658_v14, %v1591_v6  ;;  %2579 = vtanh.f32 %v1458_v60  ;;  %v1462_v23 = vadd.f32 %v1265_v20, %v3154_v37  ;;  %v1596_v60 = vmul.f32 %v3247_v31, %v3034_v16 }
 0x2dc   :  { %v1455_v27 = vadd.f32 %v1230_v26, %v3158_v46  ;;  %v2562_v28 = vpop.eup %2561  ;;  %v1651_v35 = vrot.slane %v1650_v62, 4  ;;  %v1685_v3 = vadd.f32 %v1684_v39, %v1602_v33  ;;  %v1605_v11 = vmul.f32 %v2560_v21, %v3026_v12 }
 0x2dd   :  { %v2564_v30 = vpop.eup %2563  ;;  %v1660_v41 = vrot.slane %v1659_v22, 4  ;;  %v1595_v25 = vmul.f32 %v2562_v28, %v3029_v13  ;;  %2581 = vtanh.f32 %v1462_v23  ;;  %v1675_v8 = vadd.f32 %v1597_v34, %v1596_v60 }
 0x2de   :  { %v2566_v32 = vpop.eup %2565  ;;  %v1652_v37 = vadd.f32 %v1651_v35, %v1650_v62  ;;  %2583 = vtanh.f32 %v1455_v27  ;;  %v1270_v52 = vpop.permute.xlu1 %1269  ;;  %v1598_v1 = vmul.f32 %v2564_v30, %v3042_v19  ;;  %v1604_v62 = vmul.f32 %v2558_v10, %v3034_v16 }
 0x2df   :  { %v1250_v54 = vpop.permute.xlu0 %1249  ;;  %v2568_v45 = vpop.eup %2567  ;;  %v1661_v57 = vadd.f32 %v1660_v41, %v1659_v22  ;;  %v1668_v40 = vadd.f32 %v1667_v36, %v1595_v25  ;;  %v1463_v58 = vadd.f32 %v1270_v52, %v3158_v46  ;;  %v1608_v23 = vmul.f32 %v2566_v32, %v3034_v16 }
 0x2e0   :  { %v1459_v42 = vadd.f32 %v1250_v54, %v3158_v46  ;;  %v2570_v5 = vpop.eup %2569  ;;  %v1653_v4 = vrot.slane %v1652_v37, 2  ;;  %v1676_v28 = vadd.f32 %v1675_v8, %v1598_v1  ;;  %v1693_v41 = vadd.f32 %v1605_v11, %v1604_v62 }
 0x2e1   :  { %v2572_v17 = vpop.eup %2571  ;;  %v1662_v44 = vrot.slane %v1661_v57, 2  ;;  %v1669_v14 = vrot.slane %v1668_v40, 4  ;;  %v1603_v59 = vmul.f32 %v2570_v5, %v3029_v13  ;;  %2585 = vtanh.f32 %v1463_v58 }
 0x2e2   :  { %v2574_v6 = vpop.eup %2573  ;;  %v1654_v46 = vadd.f32 %v1653_v4, %v1652_v37  ;;  %2587 = vtanh.f32 %v1459_v42  ;;  %v1606_v63 = vmul.f32 %v2572_v17, %v3042_v19  ;;  %v1609_v25 = vmul.f32 %v2568_v45, %v3026_v12 }
 0x2e3   :  { %v2576_v61 = vpop.eup %2575  ;;  %v1663_v31 = vadd.f32 %v1662_v44, %v1661_v57  ;;  %v1670_v20 = vadd.f32 %v1669_v14, %v1668_v40  ;;  %v1686_v26 = vadd.f32 %v1685_v3, %v1603_v59  ;;  %v1612_v40 = vmul.f32 %v2574_v6, %v3034_v16 }
 0x2e4   :  { %v2578_v22 = vpop.eup %2577  ;;  %v1655_v27 = vrot.slane %v1654_v46, 1  ;;  %v1613_v10 = vmul.f32 %v2576_v61, %v3026_v12  ;;  %v1694_v58 = vadd.f32 %v1693_v41, %v1606_v63  ;;  %v1702_v14 = vadd.f32 %v1609_v25, %v1608_v23 }
 0x2e5   :  { %v2580_v33 = vpop.eup %2579  ;;  %v1664_v35 = vrot.slane %v1663_v31, 1  ;;  %v1671_v30 = vrot.slane %v1670_v20, 2  ;;  %v1687_v36 = vrot.slane %v1686_v26, 4  ;;  %v1599_v21 = vmul.f32 %v2578_v22, %v3029_v13 }
 0x2e6   :  { %v1656_v34 = vadd.f32 %v1655_v27, %v1654_v46  ;;  %v1610_v42 = vmul.f32 %v2580_v33, %v3042_v19  ;;  %v1711_v1 = vadd.f32 %v1613_v10, %v1612_v40 }
 0x2e7   :  { %v2582_v39 = vpop.eup %2581  ;;  %v1665_v37 = vadd.f32 %v1664_v35, %v1663_v31  ;;  %v1672_v52 = vadd.f32 %v1671_v30, %v1670_v20  ;;  %v1688_v32 = vadd.f32 %v1687_v36, %v1686_v26  ;;  %v1677_v54 = vadd.f32 %v1676_v28, %v1599_v21  ;;  %v3297_v36 = vpop.permute.xlu0 %1329 }
 0x2e8   :  { %v2584_v57 = vpop.eup %2583  ;;  %v1614_v5 = vmul.f32 %v2582_v39, %v3042_v19  ;;  %v1703_v31 = vadd.f32 %v1702_v14, %v1610_v42 }
 0x2e9   :  { %v1673_v60 = vrot.slane %v1672_v52, 1  ;;  %v1678_v3 = vrot.slane %v1677_v54, 4  ;;  %v1607_v45 = vmul.f32 %v2584_v57, %v3029_v13  ;;  %v1689_v4 = vrot.slane %v1688_v32, 2 }
 0x2ea   :  { %v1815_v17 = vsel %vm1814_vm2, %v1665_v37, %v1656_v34  ;;  %v1712_v46 = vadd.f32 %v1711_v1, %v1614_v5 }
 0x2eb   :  { %v2586_v44 = vpop.eup %2585  ;;  %v1679_v59 = vadd.f32 %v1678_v3, %v1677_v54  ;;  %v1695_v8 = vadd.f32 %v1694_v58, %v1607_v45  ;;  %v1674_v11 = vadd.f32 %v1673_v60, %v1672_v52  ;;  %v1690_v62 = vadd.f32 %v1689_v4, %v1688_v32  ;;  %v1395_v5 = vpop.permute.xlu0 %1394 }
 0x2ec   :  { %v2588_v6 = vpop.eup %2587  ;;  %v1615_v61 = vmul.f32 %v2586_v44, %v3029_v13  ;;  %v3302_v4 = vand.u32 127, %v490_v9 }
 0x2ed   :  { %v1680_v20 = vrot.slane %v1679_v59, 2  ;;  %v1696_v26 = vrot.slane %v1695_v8, 4  ;;  %v1611_v22 = vmul.f32 %v2588_v6, %v3029_v13  ;;  %v1817_v28 = vsel %vm1816_vm3, %v1674_v11, %v1815_v17 }
 0x2ee   :  { %v1713_v27 = vadd.f32 %v1712_v46, %v1615_v61  ;;  %v1691_v23 = vrot.slane %v1690_v62, 1  ;;  %vm1797_vm9 = vcmp.lt.s32.totalorder %v3302_v4, 8  ;;  %v1380_v61 = vpop.permute.xlu1 %1379 }
 0x2ef   :  { %v1681_v63 = vadd.f32 %v1680_v20, %v1679_v59  ;;  %v1704_v33 = vadd.f32 %v1703_v31, %v1611_v22  ;;  %v1697_v35 = vadd.f32 %v1696_v26, %v1695_v8  ;;  %v3306_v59 = vpop.permute.xlu0 %1349 }
 0x2f0   :  { %v1714_v30 = vrot.slane %v1713_v27, 4  ;;  %v1692_v52 = vadd.f32 %v1691_v23, %v1690_v62 }
 0x2f1   :  { %v1682_v21 = vrot.slane %v1681_v63, 1  ;;  %v1698_v41 = vrot.slane %v1697_v35, 2  ;;  %v1705_v25 = vrot.slane %v1704_v33, 4 }
 0x2f2   :  { %v1715_v10 = vadd.f32 %v1714_v30, %v1713_v27  ;;  %v1365_v31 = vpop.permute.xlu1 %1364 }
 0x2f3   :  { %v1683_v34 = vadd.f32 %v1682_v21, %v1681_v63  ;;  %v1699_v39 = vadd.f32 %v1698_v41, %v1697_v35  ;;  %v1706_v37 = vadd.f32 %v1705_v25, %v1704_v33  ;;  %v1415_v6 = vpop.permute.xlu0 %1414 }
 0x2f4   :  { %v1716_v32 = vrot.slane %v1715_v10, 2 }
 0x2f5   :  { %v1700_v54 = vrot.slane %v1699_v39, 1  ;;  %v1707_v57 = vrot.slane %v1706_v37, 2  ;;  %v1819_v40 = vsel %vm1818_vm4, %v1683_v34, %v1817_v28 }
 0x2f6   :  { %v1717_v58 = vadd.f32 %v1716_v32, %v1715_v10  ;;  %v1821_v42 = vsel %vm1820_vm5, %v1692_v52, %v1819_v40  ;;  %v1400_v26 = vpop.permute.xlu1 %1399  ;;  %v2719_v40 = vmov 0.0  }
 0x2f7   :  { %v1708_v60 = vadd.f32 %v1707_v57, %v1706_v37  ;;  %v1701_v3 = vadd.f32 %v1700_v54, %v1699_v39  ;;  %v3315_v46 = vpop.permute.xlu0 %1369  ;;  %141 = vst.msk [vmem:[#allocation4] sm:$0xff] %vm138_vm1, %v2719_v40  ;;  %142 = vst.msk [vmem:[#allocation4 + $0x8] sm:$0xff] %vm138_vm1, %v2719_v40  ;;  %2361 = vmatprep.mubr.msk.f32.mxu0 %vm2721_vm10, %v2719_v40 }
 0x2f8   :  { %v1718_v45 = vrot.slane %v1717_v58, 1 }
 0x2f9   :  { %v1709_v1 = vrot.slane %v1708_v60, 1  ;;  %v1823_v14 = vsel %vm1822_vm6, %v1701_v3, %v1821_v42 }
 0x2fa   :  { %v1719_v17 = vadd.f32 %v1718_v45, %v1717_v58  ;;  %v1385_v35 = vpop.permute.xlu1 %1384 }
 0x2fb   :  { %v1710_v44 = vadd.f32 %v1709_v1, %v1708_v60  ;;  %v3317_v62 = vpop.permute.xlu0 %1389 }
 0x2fd   :  { %v1825_v8 = vsel %vm1824_vm7, %v1710_v44, %v1823_v14 }
 0x2fe   :  { %v1827_v11 = vsel %vm1826_vm8, %v1719_v17, %v1825_v8 }
 0x2ff   :  { %v3312_v9 = vsel %vm1797_vm9, %v1827_v11, -inf  ;;  %v3319_v20 = vpop.permute.xlu0 %1409 }
 0x300   :  { %1841 = vmax.xlane.f32.xlu1 %v3312_v9 }
 0x319   :  { %v466_v22 = vpop.trf.xlu0 }
 0x31a   :  { %v1464_v27 = vadd.f32 %v3165_v38, %v466_v22  ;;  %v1468_v28 = vadd.f32 %v3169_v49, %v466_v22  ;;  %v1472_v63 = vadd.f32 %v3173_v51, %v466_v22  ;;  %v1476_v33 = vadd.f32 %v3175_v53, %v466_v22  ;;  %v1420_v51 = vpop.permute.xlu1 %1419 }
 0x31b   :  { %v1480_v23 = vadd.f32 %v3146_v43, %v466_v22  ;;  %v1484_v30 = vadd.f32 %v3177_v55, %v466_v22  ;;  %v1488_v41 = vadd.f32 %v1395_v5, %v466_v22  ;;  %v1492_v25 = vadd.f32 %v1415_v6, %v466_v22 }
 0x31c   :  { %2589 = vtanh.f32 %v1464_v27 }
 0x31d   :  { %2591 = vtanh.f32 %v1468_v28  ;;  %v467_v21 = vpop.trf.xlu0 }
 0x31e   :  { %2593 = vtanh.f32 %v1472_v63  ;;  %v1465_v38 = vadd.f32 %v3162_v47, %v467_v21  ;;  %v1469_v49 = vadd.f32 %v3167_v48, %v467_v21  ;;  %v1473_v53 = vadd.f32 %v3171_v50, %v467_v21  ;;  %v1405_v32 = vpop.permute.xlu1 %1404 }
 0x31f   :  { %2595 = vtanh.f32 %v1476_v33  ;;  %v1477_v43 = vadd.f32 %v3180_v56, %v467_v21  ;;  %v1481_v55 = vadd.f32 %v3191_v2, %v467_v21  ;;  %v1485_v10 = vadd.f32 %v1380_v61, %v467_v21 }
 0x320   :  { %2597 = vtanh.f32 %v1480_v23  ;;  %v1489_v37 = vadd.f32 %v1400_v26, %v467_v21  ;;  %v1493_v52 = vadd.f32 %v1420_v51, %v467_v21 }
 0x321   :  { %2599 = vtanh.f32 %v1484_v30  ;;  %v468_v34 = vpop.trf.xlu0 }
 0x322   :  { %2601 = vtanh.f32 %v1488_v41  ;;  %v1466_v50 = vadd.f32 %v3200_v7, %v468_v34  ;;  %v1470_v56 = vadd.f32 %v3194_v0, %v468_v34  ;;  %v1474_v57 = vadd.f32 %v3208_v15, %v468_v34  ;;  %v1425_v15 = vpop.permute.xlu1 %1424 }
 0x323   :  { %2603 = vtanh.f32 %v1492_v25  ;;  %v1478_v42 = vadd.f32 %v3222_v18, %v468_v34  ;;  %v1482_v5 = vadd.f32 %v1365_v31, %v468_v34  ;;  %v1486_v0 = vadd.f32 %v1385_v35, %v468_v34 }
 0x324   :  { %2605 = vtanh.f32 %v1465_v38  ;;  %v1490_v1 = vadd.f32 %v1405_v32, %v468_v34  ;;  %v1494_v44 = vadd.f32 %v1425_v15, %v468_v34 }
 0x325   :  { %2607 = vtanh.f32 %v1469_v49  ;;  %v469_v3 = vpop.trf.xlu0 }
 0x326   :  { %v2590_v39 = vpop.eup %2589  ;;  %2609 = vtanh.f32 %v1473_v53  ;;  %v1467_v8 = vadd.f32 %v3215_v24, %v469_v3  ;;  %v1471_v18 = vadd.f32 %v3224_v29, %v469_v3  ;;  %v1475_v61 = vadd.f32 %v3297_v36, %v469_v3  ;;  %v1430_v33 = vpop.permute.xlu1 %1429 }
 0x327   :  { %v2592_v47 = vpop.eup %2591  ;;  %2611 = vtanh.f32 %v1477_v43  ;;  %v1479_v26 = vadd.f32 %v3306_v59, %v469_v3  ;;  %v1483_v27 = vadd.f32 %v3315_v46, %v469_v3  ;;  %v1487_v63 = vadd.f32 %v3317_v62, %v469_v3 }
 0x328   :  { %v2594_v48 = vpop.eup %2593  ;;  %2613 = vtanh.f32 %v1481_v55  ;;  %v1616_v29 = vmul.f32 %v2590_v39, %v3034_v16  ;;  %v1620_v35 = vmul.f32 %v2592_v47, %v3034_v16  ;;  %v1491_v36 = vadd.f32 %v3319_v20, %v469_v3 }
 0x329   :  { %v2596_v54 = vpop.eup %2595  ;;  %2615 = vtanh.f32 %v1485_v10  ;;  %v1495_v30 = vadd.f32 %v1430_v33, %v469_v3  ;;  %v1624_v59 = vmul.f32 %v2594_v48, %v3034_v16 }
 0x32a   :  { %v2598_v2 = vpop.eup %2597  ;;  %2617 = vtanh.f32 %v1489_v37  ;;  %v1628_v46 = vmul.f32 %v2596_v54, %v3034_v16 }
 0x32b   :  { %v2600_v58 = vpop.eup %2599  ;;  %2619 = vtanh.f32 %v1493_v52  ;;  %v1632_v25 = vmul.f32 %v2598_v2, %v3034_v16 }
 0x32c   :  { %v2602_v7 = vpop.eup %2601  ;;  %2621 = vtanh.f32 %v1466_v50  ;;  %v1636_v51 = vmul.f32 %v2600_v58, %v3034_v16 }
 0x32d   :  { %v2604_v60 = vpop.eup %2603  ;;  %2623 = vtanh.f32 %v1470_v56  ;;  %v1640_v10 = vmul.f32 %v2602_v7, %v3034_v16 }
 0x32e   :  { %v2606_v45 = vpop.eup %2605  ;;  %2625 = vtanh.f32 %v1474_v57  ;;  %v1644_v47 = vmul.f32 %v2604_v60, %v3034_v16 }
 0x32f   :  { %v2608_v17 = vpop.eup %2607  ;;  %2627 = vtanh.f32 %v1478_v42  ;;  %v1617_v62 = vmul.f32 %v2606_v45, %v3026_v12 }
 0x330   :  { %v2610_v14 = vpop.eup %2609  ;;  %2629 = vtanh.f32 %v1482_v5  ;;  %v1621_v41 = vmul.f32 %v2608_v17, %v3026_v12 }
 0x331   :  { %v2612_v11 = vpop.eup %2611  ;;  %2631 = vtanh.f32 %v1486_v0  ;;  %v1625_v20 = vmul.f32 %v2610_v14, %v3026_v12  ;;  %v1720_v50 = vadd.f32 %v1617_v62, %v1616_v29 }
 0x332   :  { %v2614_v6 = vpop.eup %2613  ;;  %2633 = vtanh.f32 %v1490_v1  ;;  %v1629_v49 = vmul.f32 %v2612_v11, %v3026_v12  ;;  %v1729_v54 = vadd.f32 %v1621_v41, %v1620_v35 }
 0x333   :  { %v2616_v31 = vpop.eup %2615  ;;  %2635 = vtanh.f32 %v1494_v44  ;;  %v1633_v43 = vmul.f32 %v2614_v6, %v3026_v12  ;;  %v1738_v58 = vadd.f32 %v1625_v20, %v1624_v59 }
 0x334   :  { %v2618_v22 = vpop.eup %2617  ;;  %2637 = vtanh.f32 %v1467_v8  ;;  %v1637_v55 = vmul.f32 %v2616_v31, %v3026_v12  ;;  %v1747_v42 = vadd.f32 %v1629_v49, %v1628_v46 }
 0x335   :  { %v2620_v28 = vpop.eup %2619  ;;  %2639 = vtanh.f32 %v1471_v18  ;;  %v1641_v37 = vmul.f32 %v2618_v22, %v3026_v12  ;;  %v1756_v16 = vadd.f32 %v1633_v43, %v1632_v25 }
 0x336   :  { %v2622_v24 = vpop.eup %2621  ;;  %2641 = vtanh.f32 %v1475_v61  ;;  %v1645_v32 = vmul.f32 %v2620_v28, %v3026_v12  ;;  %v1765_v60 = vadd.f32 %v1637_v55, %v1636_v51 }
 0x337   :  { %v2624_v23 = vpop.eup %2623  ;;  %2643 = vtanh.f32 %v1479_v26  ;;  %v1618_v39 = vmul.f32 %v2622_v24, %v3042_v19  ;;  %v1774_v1 = vadd.f32 %v1641_v37, %v1640_v10 }
 0x338   :  { %v2626_v21 = vpop.eup %2625  ;;  %2645 = vtanh.f32 %v1483_v27  ;;  %v1622_v48 = vmul.f32 %v2624_v23, %v3042_v19  ;;  %v1783_v11 = vadd.f32 %v1645_v32, %v1644_v47 }
 0x339   :  { %v2628_v38 = vpop.eup %2627  ;;  %2647 = vtanh.f32 %v1487_v63  ;;  %v1626_v2 = vmul.f32 %v2626_v21, %v3042_v19  ;;  %v1721_v15 = vadd.f32 %v1720_v50, %v1618_v39 }
 0x33a   :  { %v2630_v53 = vpop.eup %2629  ;;  %2649 = vtanh.f32 %v1491_v36  ;;  %v1630_v57 = vmul.f32 %v2628_v38, %v3042_v19  ;;  %v1730_v8 = vadd.f32 %v1729_v54, %v1622_v48 }
 0x33b   :  { %v2632_v34 = vpop.eup %2631  ;;  %2651 = vtanh.f32 %v1495_v30  ;;  %v1634_v5 = vmul.f32 %v2630_v53, %v3042_v19  ;;  %v1739_v31 = vadd.f32 %v1738_v58, %v1626_v2 }
 0x33c   :  { %v2634_v52 = vpop.eup %2633  ;;  %v1638_v0 = vmul.f32 %v2632_v34, %v3042_v19  ;;  %v1748_v26 = vadd.f32 %v1747_v42, %v1630_v57 }
 0x33d   :  { %v2636_v56 = vpop.eup %2635  ;;  %v1642_v12 = vmul.f32 %v2634_v52, %v3042_v19  ;;  %v1757_v63 = vadd.f32 %v1756_v16, %v1634_v5 }
 0x33e   :  { %v2638_v7 = vpop.eup %2637  ;;  %v1646_v14 = vmul.f32 %v2636_v56, %v3042_v19  ;;  %v1766_v24 = vadd.f32 %v1765_v60, %v1638_v0 }
 0x33f   :  { %v2640_v3 = vpop.eup %2639  ;;  %v1619_v45 = vmul.f32 %v2638_v7, %v3029_v13  ;;  %v1775_v19 = vadd.f32 %v1774_v1, %v1642_v12 }
 0x340   :  { %v2642_v17 = vpop.eup %2641  ;;  %v1623_v44 = vmul.f32 %v2640_v3, %v3029_v13  ;;  %v1784_v21 = vadd.f32 %v1783_v11, %v1646_v14 }
 0x341   :  { %v2644_v18 = vpop.eup %2643  ;;  %v1627_v6 = vmul.f32 %v2642_v17, %v3029_v13  ;;  %v1722_v61 = vadd.f32 %v1721_v15, %v1619_v45 }
 0x342   :  { %v2646_v22 = vpop.eup %2645  ;;  %v1631_v27 = vmul.f32 %v2644_v18, %v3029_v13  ;;  %v1731_v28 = vadd.f32 %v1730_v8, %v1623_v44 }
 0x343   :  { %v2648_v33 = vpop.eup %2647  ;;  %v1635_v29 = vmul.f32 %v2646_v22, %v3029_v13  ;;  %v1723_v35 = vrot.slane %v1722_v61, 4  ;;  %v1740_v36 = vadd.f32 %v1739_v31, %v1627_v6 }
 0x344   :  { %v2650_v23 = vpop.eup %2649  ;;  %v1639_v30 = vmul.f32 %v2648_v33, %v3029_v13  ;;  %v1732_v59 = vrot.slane %v1731_v28, 4  ;;  %v1749_v46 = vadd.f32 %v1748_v26, %v1631_v27 }
 0x345   :  { %v2652_v62 = vpop.eup %2651  ;;  %v1643_v41 = vmul.f32 %v2650_v23, %v3029_v13  ;;  %v1724_v25 = vadd.f32 %v1723_v35, %v1722_v61  ;;  %v1741_v38 = vrot.slane %v1740_v36, 4  ;;  %v1758_v20 = vadd.f32 %v1757_v63, %v1635_v29 }
 0x346   :  { %v1647_v49 = vmul.f32 %v2652_v62, %v3029_v13  ;;  %v1733_v51 = vadd.f32 %v1732_v59, %v1731_v28  ;;  %v1750_v53 = vrot.slane %v1749_v46, 4  ;;  %v1767_v43 = vadd.f32 %v1766_v24, %v1639_v30  ;;  %v1896_v62 = vld [vmem:[#allocation6] sm:$0xff] }
 0x347   :  { %v1725_v55 = vrot.slane %v1724_v25, 2  ;;  %v1742_v10 = vadd.f32 %v1741_v38, %v1740_v36  ;;  %v1759_v34 = vrot.slane %v1758_v20, 4  ;;  %v1776_v39 = vadd.f32 %v1775_v19, %v1643_v41  ;;  %v1897_v41 = vld [vmem:[#allocation6 + $0x8] sm:$0xff] }
 0x348   :  { %v1734_v37 = vrot.slane %v1733_v51, 2  ;;  %v1751_v47 = vadd.f32 %v1750_v53, %v1749_v46  ;;  %v1768_v52 = vrot.slane %v1767_v43, 4  ;;  %v1785_v48 = vadd.f32 %v1784_v21, %v1647_v49  ;;  %v1899_v49 = vld [vmem:[#allocation6 + $0x18] sm:$0xff]  ;;  %v1900_v53 = vld [vmem:[#allocation6 + $0x20] sm:$0xff] }
 0x349   :  { %v1726_v32 = vadd.f32 %v1725_v55, %v1724_v25  ;;  %v1743_v50 = vrot.slane %v1742_v10, 2  ;;  %v1760_v54 = vadd.f32 %v1759_v34, %v1758_v20  ;;  %v1777_v56 = vrot.slane %v1776_v39, 4  ;;  %v1898_v25 = vld [vmem:[#allocation6 + $0x10] sm:$0xff] }
 0x34a   :  { %v1735_v2 = vadd.f32 %v1734_v37, %v1733_v51  ;;  %v1752_v57 = vrot.slane %v1751_v47, 2  ;;  %v1769_v58 = vadd.f32 %v1768_v52, %v1767_v43  ;;  %v1786_v42 = vrot.slane %v1785_v48, 4  ;;  %v1901_v43 = vld [vmem:[#allocation6 + $0x28] sm:$0xff]  ;;  %v1902_v55 = vld [vmem:[#allocation6 + $0x30] sm:$0xff] }
 0x34b   :  { %v1727_v13 = vrot.slane %v1726_v32, 1  ;;  %v1744_v7 = vadd.f32 %v1743_v50, %v1742_v10  ;;  %v1761_v5 = vrot.slane %v1760_v54, 2  ;;  %v1778_v0 = vadd.f32 %v1777_v56, %v1776_v39  ;;  %v1903_v10 = vld [vmem:[#allocation6 + $0x38] sm:$0xff]  ;;  %v3396_v39 = vld [vmem:[#allocation3] sm:$0xff]  ;;  %v1906_v50 = vld [vmem:[#allocation6 + $0x50] sm:$0xff] }
 0x34c   :  { %v1736_v16 = vrot.slane %v1735_v2, 1  ;;  %v1753_v60 = vadd.f32 %v1752_v57, %v1751_v47  ;;  %v1770_v3 = vrot.slane %v1769_v58, 2  ;;  %v1787_v45 = vadd.f32 %v1786_v42, %v1785_v48  ;;  %v1904_v48 = vld [vmem:[#allocation6 + $0x40] sm:$0xff]  ;;  %v1907_v56 = vld [vmem:[#allocation6 + $0x58] sm:$0xff] }
 0x34d   :  { %v1728_v12 = vadd.f32 %v1727_v13, %v1726_v32  ;;  %v1745_v15 = vrot.slane %v1744_v7, 1  ;;  %v1762_v1 = vadd.f32 %v1761_v5, %v1760_v54  ;;  %v1779_v17 = vrot.slane %v1778_v0, 2  ;;  %v1905_v32 = vld [vmem:[#allocation6 + $0x48] sm:$0xff]  ;;  %v1908_v57 = vld [vmem:[#allocation6 + $0x60] sm:$0xff]  ;;  %v1910_v13 = vld [vmem:[#allocation6 + $0x70] sm:$0xff] }
 0x34e   :  { %v1737_v44 = vadd.f32 %v1736_v16, %v1735_v2  ;;  %v1754_v14 = vrot.slane %v1753_v60, 1  ;;  %v1771_v8 = vadd.f32 %v1770_v3, %v1769_v58  ;;  %v1788_v11 = vrot.slane %v1787_v45, 2  ;;  %v1909_v58 = vld [vmem:[#allocation6 + $0x68] sm:$0xff] }
 0x34f   :  { %v1746_v18 = vadd.f32 %v1745_v15, %v1744_v7  ;;  %v1763_v6 = vrot.slane %v1762_v1, 1  ;;  %v1780_v61 = vadd.f32 %v1779_v17, %v1778_v0  ;;  %v2720_v38 = vmov 0.0|0.0   ;;  %v1911_v7 = vld [vmem:[#allocation6 + $0x78] sm:$0xff]  ;;  %v3412_v0 = vld [vmem:[#allocation3 + $0x8] sm:$0xff] }
 0x350   :  { %v1755_v31 = vadd.f32 %v1754_v14, %v1753_v60  ;;  %v1772_v26 = vrot.slane %v1771_v8, 1  ;;  %v1789_v22 = vadd.f32 %v1788_v11, %v1787_v45  ;;  %v1828_v27 = vsel %vm1814_vm2, %v1737_v44, %v1728_v12  ;;  %2463 = vmatprep.subr.bf16.mxu0 %v2720_v38  ;;  %v1913_v17 = vld [vmem:[#allocation6 + $0x88] sm:$0xff]  ;;  %v1914_v14 = vld [vmem:[#allocation6 + $0x90] sm:$0xff] }
 0x351   :  { %v1764_v28 = vadd.f32 %v1763_v6, %v1762_v1  ;;  %v1781_v63 = vrot.slane %v1780_v61, 1  ;;  %v1829_v24 = vsel %vm1816_vm3, %v1746_v18, %v1828_v27  ;;  %v2464_v20 = vpack.c.bf16 %v1897_v41, %v1896_v62  ;;  %v1912_v1 = vld [vmem:[#allocation6 + $0x80] sm:$0xff] }
 0x352   :  { %v1773_v33 = vadd.f32 %v1772_v26, %v1771_v8  ;;  %v1790_v29 = vrot.slane %v1789_v22, 1  ;;  %v1830_v35 = vsel %vm1818_vm4, %v1755_v31, %v1829_v24  ;;  %v2467_v51 = vpack.c.bf16 %v1899_v49, %v1898_v25  ;;  %v1915_v8 = vld [vmem:[#allocation6 + $0x98] sm:$0xff]  ;;  %v1916_v6 = vld [vmem:[#allocation6 + $0xa0] sm:$0xff]  ;;  %v1918_v31 = vld [vmem:[#allocation6 + $0xb0] sm:$0xff] }
 0x353   :  { %v1782_v36 = vadd.f32 %v1781_v63, %v1780_v61  ;;  %v1831_v19 = vsel %vm1820_vm5, %v1764_v28, %v1830_v35  ;;  %2465 = vmatpush3.bf16.msra.mxu0 %v2464_v20  ;;  %v2470_v4 = vpack.c.bf16 %v1901_v43, %v1900_v53  ;;  %v2473_v34 = vpack.c.bf16 %v1903_v10, %v1902_v55  ;;  %v1917_v61 = vld [vmem:[#allocation6 + $0xa8] sm:$0xff]  ;;  %v1919_v26 = vld [vmem:[#allocation6 + $0xb8] sm:$0xff]  ;;  %v1920_v27 = vld [vmem:[#allocation6 + $0xc0] sm:$0xff] }
 0x354   :  { %v1791_v23 = vadd.f32 %v1790_v29, %v1789_v22  ;;  %v1832_v30 = vsel %vm1822_vm6, %v1773_v33, %v1831_v19  ;;  %2466 = vmatprep.subr.bf16.mxu0 %v2720_v38  ;;  %v2476_v54 = vpack.c.bf16 %v1905_v32, %v1904_v48  ;;  %v2479_v2 = vpack.c.bf16 %v1907_v56, %v1906_v50  ;;  %v1921_v28 = vld [vmem:[#allocation6 + $0xc8] sm:$0xff]  ;;  %v1923_v24 = vld [vmem:[#allocation6 + $0xd8] sm:$0xff]  ;;  %v1924_v29 = vld [vmem:[#allocation6 + $0xe0] sm:$0xff] }
 0x355   :  { %v1833_v59 = vsel %vm1824_vm7, %v1782_v36, %v1832_v30  ;;  %v2482_v42 = vpack.c.bf16 %v1909_v58, %v1908_v57  ;;  %v2485_v5 = vpack.c.bf16 %v1911_v7, %v1910_v13  ;;  %v2488_v44 = vpack.c.bf16 %v1913_v17, %v1912_v1  ;;  %v1925_v35 = vld [vmem:[#allocation6 + $0xe8] sm:$0xff]  ;;  %v1926_v19 = vld [vmem:[#allocation6 + $0xf0] sm:$0xff]  ;;  %v1870_v10 = vld [vmem:[#allocation4 + $0x8] sm:$0xff] }
 0x356   :  { %v1834_v46 = vsel %vm1826_vm8, %v1791_v23, %v1833_v59  ;;  %v2491_v18 = vpack.c.bf16 %v1915_v8, %v1914_v14  ;;  %v2497_v22 = vpack.c.bf16 %v1919_v26, %v1918_v31  ;;  %v2500_v63 = vpack.c.bf16 %v1921_v28, %v1920_v27  ;;  %v1927_v23 = vld [vmem:[#allocation6 + $0xf8] sm:$0xff]  ;;  %v1869_v49 = vld [vmem:[#allocation4] sm:$0xff] }
 0x357   :  { %v3388_v21 = vsel %vm1797_vm9, %v1834_v46, -inf  ;;  %2468 = vmatpush3.bf16.msra.mxu0 %v2467_v51  ;;  %v2506_v36 = vpack.c.bf16 %v1925_v35, %v1924_v29  ;;  %v2509_v30 = vpack.c.bf16 %v1927_v23, %v1926_v19 }
 0x358   :  { %1843 = vmax.xlane.f32.xlu1 %v3388_v21  ;;  %2469 = vmatprep.subr.bf16.mxu0 %v2720_v38 }
 0x35b   :  { %2471 = vmatpush3.bf16.msra.mxu0 %v2470_v4 }
 0x35c   :  { %2472 = vmatprep.subr.bf16.mxu0 %v2720_v38 }
 0x35f   :  { %2474 = vmatpush3.bf16.msra.mxu0 %v2473_v34 }
 0x360   :  { %2475 = vmatprep.subr.bf16.mxu0 %v2720_v38 }
 0x363   :  { %2477 = vmatpush3.bf16.msra.mxu0 %v2476_v54 }
 0x364   :  { %2478 = vmatprep.subr.bf16.mxu0 %v2720_v38 }
 0x367   :  { %2480 = vmatpush3.bf16.msra.mxu0 %v2479_v2 }
 0x368   :  { %2481 = vmatprep.subr.bf16.mxu0 %v2720_v38 }
 0x36b   :  { %2483 = vmatpush3.bf16.msra.mxu0 %v2482_v42 }
 0x36c   :  { %2484 = vmatprep.subr.bf16.mxu0 %v2720_v38 }
 0x36f   :  { %2486 = vmatpush3.bf16.msra.mxu0 %v2485_v5 }
 0x370   :  { %2487 = vmatprep.subr.bf16.mxu0 %v2720_v38 }
 0x38d   :  { %v1842_v37 = vpop.xlane.xlu1 %1841 }
 0x38e   :  { %v3399_v47 = vmax.f32 %v3396_v39, %v1842_v37 }
 0x390   :  { %v1847_v52 = vsub.f32 %v3396_v39, %v3399_v47  ;;  %2072 = vst.msk [vmem:[#allocation3] sm:$0xff] %vm138_vm1, %v3399_v47  ;;  %1855 = vperm.xlu1 %2522, %v3399_v47  }
 0x392   :  { %v1849_v25 = vmul.f32 1.442695, %v1847_v52 }
 0x3e5   :  { %v1844_v16 = vpop.xlane.xlu1 %1843 }
 0x3e6   :  { %v3415_v60 = vmax.f32 %v3412_v0, %v1844_v16 }
 0x3e8   :  { %v1848_v3 = vsub.f32 %v3412_v0, %v3415_v60  ;;  %2073 = vst.msk [vmem:[#allocation3 + $0x8] sm:$0xff] %vm138_vm1, %v3415_v60  ;;  %1860 = vperm.xlu1 %2522, %v3415_v60  }
 0x40f   :  { %v1856_v45 = vpop.permute.xlu1 %1855 }
 0x410   :  { %v1863_v12 = vsub.f32 %v3312_v9, %v1856_v45  ;;  %v2494_v9 = vpack.c.bf16 %v1917_v61, %v1916_v6 }
 0x412   :  { %v1865_v15 = vmul.f32 1.442695, %v1863_v12 }
 0x414   :  { %2653 = vpow2.f32 %v1865_v15 }
 0x41e   :  { %v2654_v11 = vpop.eup %2653 }
 0x41f   :  { %1873 = vadd.xlane.f32.xlu1 %v2654_v11  ;;  %2362 = vmatmul.mubr.f32.vlgmr.msra.gmra.mrb[2].mxu0 %v2654_v11 }
 0x420   :  { %2489 = vmatpush3.bf16.msra.mxu0 %v2488_v44  ;;  %2396 = vmatprep.mubr.msk.f32.mxu0 %vm2721_vm10, %v2719_v40  ;;  %v1922_v40 = vld [vmem:[#allocation6 + $0xd0] sm:$0xff] }
 0x421   :  { %2490 = vmatprep.subr.bf16.mxu0 %v2720_v38  ;;  %v2503_v33 = vpack.c.bf16 %v1923_v24, %v1922_v40 }
 0x424   :  { %2492 = vmatpush3.bf16.msra.mxu0 %v2491_v18 }
 0x425   :  { %2493 = vmatprep.subr.bf16.mxu0 %v2720_v38 }
 0x428   :  { %2495 = vmatpush3.bf16.msra.mxu0 %v2494_v9 }
 0x429   :  { %2496 = vmatprep.subr.bf16.mxu0 %v2720_v38 }
 0x42c   :  { %2498 = vmatpush3.bf16.msra.mxu0 %v2497_v22 }
 0x42d   :  { %2499 = vmatprep.subr.bf16.mxu0 %v2720_v38 }
 0x430   :  { %2501 = vmatpush3.bf16.msra.mxu0 %v2500_v63 }
 0x431   :  { %2502 = vmatprep.subr.bf16.mxu0 %v2720_v38 }
 0x434   :  { %2504 = vmatpush3.bf16.msra.mxu0 %v2503_v33 }
 0x435   :  { %2505 = vmatprep.subr.bf16.mxu0 %v2720_v38 }
 0x438   :  { %2507 = vmatpush3.bf16.msra.mxu0 %v2506_v36 }
 0x439   :  { %2508 = vmatprep.subr.bf16.mxu0 %v2720_v38 }
 0x43c   :  { %2510 = vmatpush3.bf16.msra.mxu0 %v2509_v30 }
 0x467   :  { %v1861_v59 = vpop.permute.xlu1 %1860 }
 0x468   :  { %v1864_v46 = vsub.f32 %v3388_v21, %v1861_v59  ;;  %v1851_v21 = vmul.f32 1.442695, %v1848_v3 }
 0x46a   :  { %v1867_v62 = vmul.f32 1.442695, %v1864_v46 }
 0x46c   :  { %2655 = vpow2.f32 %v1867_v62 }
 0x46d   :  { %2657 = vpow2.f32 %v1849_v25 }
 0x46e   :  { %2659 = vpow2.f32 %v1851_v21 }
 0x476   :  { %v2656_v41 = vpop.eup %2655 }
 0x477   :  { %1875 = vadd.xlane.f32.xlu0 %v2656_v41  ;;  %2397 = vmatmul.mubr.f32.vlgmr.msra.gmra.mrb[4].mxu0 %v2656_v41  ;;  %v2658_v20 = vpop.eup %2657 }
 0x478   :  { %v1871_v51 = vmul.f32 %v2658_v20, %v1869_v49  ;;  %v2660_v55 = vpop.eup %2659 }
 0x479   :  { %v1872_v34 = vmul.f32 %v2660_v55, %v1870_v10 }
 0x4ac   :  { %v1874_v53 = vpop.xlane.xlu1 %1873 }
 0x4ad   :  { %v1877_v43 = vadd.f32 %v1874_v53, %v1871_v51 }
 0x4af   :  { %1880 = vst.msk [vmem:[#allocation4] sm:$0xff] %vm138_vm1, %v1877_v43 }
 0x4b6   :  { %v2079_v52 = vld [vmem:[#allocation4] sm:$0xff] }
 0x4f2   :  { %v1994_v38 = vpop.f32.mrb[2].mxu0 }
 0x4f3   :  { %v2363_v4 = vpop.f32.mrb[3].mxu0 }
 0x504   :  { %v1876_v39 = vpop.xlane.xlu0 %1875 }
 0x505   :  { %v1878_v37 = vadd.f32 %v1876_v39, %v1872_v34 }
 0x507   :  { %1881 = vst.msk [vmem:[#allocation4 + $0x8] sm:$0xff] %vm138_vm1, %v1878_v37 }
 0x50e   :  { %v2080_v47 = vld [vmem:[#allocation4 + $0x8] sm:$0xff] }
 0x50f   :  { %2088 = vperm.xlu1 %2522, %v2080_v47  }
 0x513   :  { %2083 = vperm.xlu1 %2522, %v2079_v52  }
 0x517   :  { %1886 = vperm.xlu1 %2522, %v2658_v20  }
 0x51b   :  { %1891 = vperm.xlu1 %2522, %v2660_v55  }
 0x54a   :  { %v2064_v48 = vpop.f32.mrb[4].mxu0 }
 0x54b   :  { %v2398_v32 = vpop.f32.mrb[5].mxu0 }
 0x58e   :  { %v2089_v50 = vpop.permute.xlu1 %2088 }
 0x592   :  { %v2084_v54 = vpop.permute.xlu1 %2083 }
 0x593   :  { %2661 = vrcp.f32 %v2084_v54 }
 0x594   :  { %2663 = vrcp.f32 %v2089_v50 }
 0x596   :  { %v1887_v56 = vpop.permute.xlu1 %1886 }
 0x597   :  { %v1894_v2 = vmul.f32 0.0, %v1887_v56 }
 0x599   :  { %v2068_v42 = vadd.f32 %v1994_v38, %v1894_v2 }
 0x59a   :  { %v1892_v57 = vpop.permute.xlu1 %1891 }
 0x59b   :  { %v1895_v58 = vmul.f32 0.0, %v1892_v57 }
 0x59d   :  { %v2662_v13 = vpop.eup %2661  ;;  %v2069_v7 = vadd.f32 %v2064_v48, %v1895_v58 }
 0x59e   :  { %v2664_v5 = vpop.eup %2663  ;;  %v2092_v0 = vmul.f32 %v2662_v13, %v2068_v42 }
 0x59f   :  { %v2094_v16 = vmul.f32 %v2664_v5, %v2069_v7 }
 0x5a0   :  { %2095 = vst [vmem:[#allocation9] sm:$0xff] %v2092_v0 }
 0x5a1   :  { %2096 = vst [vmem:[#allocation9 + $0x8] sm:$0xff] %v2094_v16 }
 0x5a2   :  { %2698 = shalt.err (!%p2695_p12)
}
 0x5a3   :  { %s2699_s27 = scalar_lea.hbm %s3462_s6, 256 }
 0x5a4   :  { %p2700_p13 = scmp.ne.s32.totalorder %s3462_s6, %s2699_s27  ;;  %p2703_p0 = scmp.lt.u32.totalorder %s2699_s27, %s3462_s6 }
 0x5a6   :  { %p2705_p1 = pnand %p2703_p0, %p2700_p13 }
 0x5a8   :  { %2708 = shalt.err (!%p2705_p1)
}
 0x5a9   :  { %2108 = dma.vmem_to_hbm [thread:$0]  %s2103_s23, 256, %s3462_s6, [#allocation8], %s2714_s7, %s2714_s7, %s2715_s8  }
 0x5aa   :  { %2711 = dma.done.wait [#allocation8], 256  }
 0x5ab   :  { %2712 = vsyncadd [#allocation8], 4294967040 }
 0x5ac   :  { %2112 = vsyncpa [#allocation7], 1 }
 0x5ad   :  { %2113 = vsyncpa [#allocation8], 1 }

</bundles_post_ra>
